<compile_context>
chip_gen: v5e
topology: v5e:2x2
jax: 0.10.0
libtpu: 0.0.40
codegen_flags: <defaults>
</compile_context>

<pallas_src>
import math

import jax
import jax.numpy as jnp
from jax import lax
from jax.experimental import pallas as pl
from jax.experimental.pallas import tpu as pltpu

MASK_VALUE = -1000000000.0


def _round_up(x, m):
    return -(-x // m) * m


def _make_kernel(use_lengths):
    def kernel(x_ref, wa_ref, wb_ref, side_ref, o_ref):
        # x_ref:    (bt, S, D)   batch tile of inputs (compute_dtype)
        # wa_ref:   (D, da)      Wa^T, pre-transposed, resident
        # wb_ref:   (1, da)      Wb row, resident (f32)
        # side_ref: (bt, 1, 1) int32 lengths  OR  (bt, S, 1) int8 mask
        # o_ref:    (bt, D)      f32 output
        bt, s_len, d = x_ref.shape

        # 1) hidden = tanh(x @ Wa): one (bt*S, D) x (D, da) MXU matmul over the
        #    whole batch tile (leading-dim merge is layout-preserving because S
        #    is padded to the sublane packing).
        x2 = x_ref[...].reshape(bt * s_len, d)
        h = jnp.tanh(jnp.dot(x2, wa_ref[...],
                             preferred_element_type=jnp.float32))   # [bt*S, da]

        # 2) scores = hidden @ Wb^T (output width 1): VPU multiply + lane reduce.
        wb = wb_ref[...].astype(jnp.float32)                         # [1, da]
        sc = jnp.sum(h * wb, axis=-1, keepdims=True)                 # [bt*S, 1]
        sc = sc.reshape(bt, s_len, 1)                                # [bt, S, 1]

        # 3) mask: single VPU select.
        if use_lengths:
            pos = lax.broadcasted_iota(jnp.int32, (bt, s_len, 1), 1)
            valid = pos < side_ref[...]                              # [bt, S, 1]
        else:
            valid = side_ref[...] != 0                               # int8 mask
        sc = jnp.where(valid, sc, MASK_VALUE)

        # 4) numerically stable softmax over the sequence (sublane) axis.
        mx = jnp.max(sc, axis=1, keepdims=True)                      # [bt, 1, 1]
        e = jnp.exp(sc - mx)                                         # [bt, S, 1]
        denom = jnp.sum(e, axis=1, keepdims=True)                    # [bt, 1, 1]
        p = e * pl.reciprocal(denom, approx=True)                    # [bt, S, 1]

        # 5) probs @ inputs (M = 1): broadcast multiply + sublane reduce.
        #    x is re-read here so it is not kept live across tanh/softmax.
        x = x_ref[...].astype(jnp.float32)                           # [bt, S, D]
        o_ref[...] = jnp.sum(p * x, axis=1).astype(o_ref.dtype)      # [bt, D]

    return kernel


def _vmem_budget():
    """(vmem_limit_bytes, block_budget_bytes), generation-aware."""
    try:
        info = pltpu.get_tpu_info()
        phys = int(getattr(info, "vmem_capacity_bytes", 64 << 20))
    except Exception:
        phys = 64 << 20       # conservative fallback: v7x physical VMEM / TC
    vmem_limit = min(phys * 3 // 4, 96 << 20)   # 48 MiB on v7x, 96 on v5e/v6e
    block_budget = vmem_limit * 3 // 5          # headroom for scratch/weights
    return int(vmem_limit), int(block_budget)


def _choose_block_b(B, S_p, D, da, in_itemsize, use_lengths, block_budget,
                    target_block_bytes=2 << 20):
    """Batch-tile size: multiple of 8, VMEM-budgeted, ~target-size input block,
    bt*S a multiple of 256 when possible, and never larger than needed."""
    lane = 128
    sub = 16 if in_itemsize == 2 else 8
    d_pad = _round_up(D, lane)
    da_pad = _round_up(da, lane)
    # Per-sequence padded VMEM footprint of each pipelined block.
    in_row = _round_up(S_p, sub) * d_pad * in_itemsize         # x block
    out_row = d_pad * 4                                        # (bt, D) f32
    if use_lengths:
        side_row = 8 * lane * 4                                # (bt,1,1) int32
    else:
        side_row = _round_up(S_p, 32) * lane                   # (bt,S,1) int8
    per_bt = 2 * (in_row + out_row + side_row)                 # double-buffered
    weights = 2 * (_round_up(D, sub) * da_pad * in_itemsize + 8 * da_pad * 4)

    bt_budget = max(8, ((block_budget - weights) // per_bt) // 8 * 8)
    bt_target = max(8, (target_block_bytes // max(in_row, 1)) // 8 * 8)
    bt = min(bt_budget, bt_target)
    if B >= 32:                       # keep >= ~4 grid steps when B allows it
        bt = min(bt, max(8, _round_up(-(-B // 4), 8)))
    bt = min(bt, _round_up(B, 8))     # never larger than the padded batch
    bt = max(8, bt)
    # Prefer bt*S to be a multiple of 256 so the MXU matmul has a full M dim.
    mult = 256 // math.gcd(256, S_p)
    mult = mult * 8 // math.gcd(mult, 8)
    if bt > mult:
        bt = (bt // mult) * mult
    return max(8, bt)


def self_attention(inputs, weights_a, weights_b, mask=None, lengths=None, *,
                   compute_dtype=jnp.bfloat16, block_b=None):
    """Self-attention sentence embedding.

    inputs:    [B, S, D]
    weights_a: [da, D]   (PyTorch nn.Linear layout, [out_features, in_features])
    weights_b: [1, da]
    mask:      optional [B, S] / [B, S, 1] binary mask (1 = valid position)
    lengths:   optional [B] int32 valid lengths (preferred: mask rebuilt
               in-kernel, no HBM mask stream)
    compute_dtype: dtype of the x / Wa HBM stream and MXU matmul (bf16 default;
               softmax and the weighted sum always run in f32)
    returns    [B, D] float32
    """
    B, S, D = inputs.shape
    da = weights_a.shape[0]
    in_dtype = jnp.dtype(compute_dtype)
    use_lengths = (lengths is not None) or (mask is None)

    # Pad S to the sublane packing so in-kernel reshapes are pure relabels.
    sub = 16 if in_dtype.itemsize == 2 else 8
    S_p = _round_up(S, sub)

    vmem_limit, block_budget = _vmem_budget()
    if block_b is not None:
        bt = max(8, _round_up(int(block_b), 8))
    else:
        bt = _choose_block_b(B, S_p, D, da, in_dtype.itemsize, use_lengths,
                             block_budget)
    bt = min(bt, max(8, _round_up(B, 8)))
    b_pad = _round_up(B, bt)

    x = inputs.astype(in_dtype)
    if S_p != S:
        x = jnp.pad(x, ((0, 0), (0, S_p - S), (0, 0)))
    if b_pad != B:
        # Zero rows -> zero scores -> uniform softmax over zeros -> zero output
        # rows (sliced off below).  No NaNs.
        x = jnp.pad(x, ((0, b_pad - B), (0, 0), (0, 0)))

    wa_t = weights_a.astype(in_dtype).T          # [D, da], hoisted transpose
    wb = weights_b.astype(jnp.float32).reshape(1, da)

    if use_lengths:
        if lengths is None:
            lengths = jnp.full((B,), S, dtype=jnp.int32)
        side = jnp.asarray(lengths, dtype=jnp.int32).reshape(B)
        if b_pad != B:
            side = jnp.pad(side, (0, b_pad - B), constant_values=S)
        side = side.reshape(b_pad, 1, 1)
        side_spec = pl.BlockSpec((bt, 1, 1), lambda b: (b, 0, 0))
    else:
        side = (jnp.asarray(mask).reshape(B, S) != 0).astype(jnp.int8)
        side = jnp.pad(side, ((0, b_pad - B), (0, S_p - S)))   # pads masked out
        side = side.reshape(b_pad, S_p, 1)
        side_spec = pl.BlockSpec((bt, S_p, 1), lambda b: (b, 0, 0))

    grid = (b_pad // bt,)
    out = pl.pallas_call(
        _make_kernel(use_lengths),
        out_shape=jax.ShapeDtypeStruct((b_pad, D), jnp.float32),
        grid_spec=pltpu.PrefetchScalarGridSpec(
            num_scalar_prefetch=0,
            grid=grid,
            in_specs=[
                pl.BlockSpec((bt, S_p, D), lambda b: (b, 0, 0)),   # inputs tile
                pl.BlockSpec((D, da), lambda b: (0, 0)),           # Wa^T resident
                pl.BlockSpec((1, da), lambda b: (0, 0)),           # Wb resident
                side_spec,                                          # lengths/mask
            ],
            out_specs=pl.BlockSpec((bt, D), lambda b: (b, 0)),     # dense 2-D out
        ),
        compiler_params=pltpu.CompilerParams(
            dimension_semantics=("parallel",),   # shard batch over v7x's 2 TCs
            vmem_limit_bytes=vmem_limit,
        ),
    )(x, wa_t, wb, side)
    return out[:B]


def init_params(dim, da, key):
    """Xavier-uniform init with tanh gain, matching the PyTorch module."""
    gain = 5.0 / 3.0  # nn.init.calculate_gain('tanh')
    k1, k2 = jax.random.split(key)
    bound_a = gain * math.sqrt(6.0 / (dim + da))
    weights_a = jax.random.uniform(k1, (da, dim), jnp.float32,
                                   minval=-bound_a, maxval=bound_a)
    bound_b = gain * math.sqrt(6.0 / (da + 1))
    weights_b = jax.random.uniform(k2, (1, da), jnp.float32,
                                   minval=-bound_b, maxval=bound_b)
    return weights_a, weights_b


def _reference(inputs, weights_a, weights_b, mask, compute_dtype=jnp.float32):
    """Pure-JAX reference (mirrors the PyTorch forward); optional input
    rounding to compute_dtype to match the kernel's HBM-stream precision."""
    x = inputs.astype(compute_dtype).astype(jnp.float32)
    wa = weights_a.astype(compute_dtype).astype(jnp.float32)
    wb = weights_b.astype(jnp.float32)
    scores = jnp.tanh(x @ wa.T) @ wb.T                           # [B, S, 1]
    scores = scores + MASK_VALUE * (1.0 - mask)
    probs = jax.nn.softmax(scores, axis=1)                       # [B, S, 1]
    probs = jnp.swapaxes(probs, 1, 2)                            # [B, 1, S]
    return jnp.squeeze(probs @ x, axis=1)                        # [B, D]


if __name__ == "__main__":
    B, S, D, DA = 12, 8, 32, 16

    key = jax.random.PRNGKey(0)
    k_in, k_param = jax.random.split(key)
    inputs = jax.random.normal(k_in, (B, S, D), jnp.float32)

    # prefix (padding) masks with varying valid lengths per sequence
    lengths = jnp.array([8, 5, 3, 8, 1, 6, 7, 2, 4, 8, 5, 3], dtype=jnp.int32)
    mask = (jnp.arange(S)[None, :] < lengths[:, None]).astype(jnp.float32)
    mask = mask[:, :, None]                                       # [B, S, 1]

    weights_a, weights_b = init_params(D, DA, k_param)

    # 1) Optimized path: per-sequence lengths (mask built in-kernel), bf16 HBM
    #    stream, VMEM-budgeted auto batch tile.
    out_bf16 = jax.block_until_ready(
        self_attention(inputs, weights_a, weights_b, lengths=lengths))
    ref_bf16 = _reference(inputs, weights_a, weights_b, mask,
                          compute_dtype=jnp.bfloat16)
    assert out_bf16.shape == (B, D)
    assert jnp.allclose(out_bf16, ref_bf16, atol=1e-2, rtol=2e-2), (
        f"bf16 path max abs err {jnp.max(jnp.abs(out_bf16 - ref_bf16))}")

    # 2) General-mask fallback path (int8 mask block), exact-f32 stream,
    #    explicit small tile so the grid has multiple steps.
    out_f32 = jax.block_until_ready(
        self_attention(inputs, weights_a, weights_b, mask=mask,
                       compute_dtype=jnp.float32, block_b=8))
    ref_f32 = _reference(inputs, weights_a, weights_b, mask)
    assert out_f32.shape == (B, D)
    assert jnp.allclose(out_f32, ref_f32, atol=2e-3, rtol=2e-2), (
        f"f32 path max abs err {jnp.max(jnp.abs(out_f32 - ref_f32))}")

    print("KERNEL_OK")
</pallas_src>

<mosaic_0001>
module attributes {stable_mosaic.version = 11 : i64} {
  func.func @kernel(%arg0: i32, %arg1: memref<16x16x32xbf16, #tpu.memory_space<vmem>>, %arg2: memref<32x16xbf16, #tpu.memory_space<vmem>>, %arg3: memref<1x16xf32, #tpu.memory_space<vmem>>, %arg4: memref<16x1x1xi32, #tpu.memory_space<vmem>>, %arg5: memref<16x32xf32, #tpu.memory_space<vmem>>) attributes {dimension_semantics = [#tpu.dimension_semantics<parallel>], iteration_bounds = array<i64: 1>, scalar_prefetch = 0 : i64, scratch_operands = 0 : i64, tpu.core_type = #tpu.core_type<tc>, window_params = [{transform_indices = @transform_0, window_bounds = array<i64: 16, 16, 32>}, {pipeline_mode = #tpu.pipeline_mode<synchronous>, transform_indices = @transform_1, window_bounds = array<i64: 32, 16>}, {pipeline_mode = #tpu.pipeline_mode<synchronous>, transform_indices = @transform_2, window_bounds = array<i64: 1, 16>}, {transform_indices = @transform_3, window_bounds = array<i64: 16, 1, 1>}, {transform_indices = @transform_4, window_bounds = array<i64: 16, 32>}]} {
    %c0 = arith.constant 0 : index
    %c0_0 = arith.constant 0 : index
    %c0_1 = arith.constant 0 : index
    %0 = vector.load %arg1[%c0, %c0_0, %c0_1] : memref<16x16x32xbf16, #tpu.memory_space<vmem>>, vector<16x16x32xbf16>
    %1 = vector.shape_cast %0 : vector<16x16x32xbf16> to vector<256x32xbf16>
    %c0_2 = arith.constant 0 : index
    %c0_3 = arith.constant 0 : index
    %2 = vector.load %arg2[%c0_2, %c0_3] : memref<32x16xbf16, #tpu.memory_space<vmem>>, vector<32x16xbf16>
    %cst = arith.constant dense<0.000000e+00> : vector<256x16xf32>
    %3 = tpu.matmul %1, %2, %cst {dimension_numbers = #tpu.dot_dimension_numbers<[1], [0], [0], [1], [0, 0, 1, 1], [], []>} : vector<256x32xbf16>, vector<32x16xbf16>, vector<256x16xf32> -> vector<256x16xf32>
    %4 = math.tanh %3 : vector<256x16xf32>
    %c0_4 = arith.constant 0 : index
    %c0_5 = arith.constant 0 : index
    %5 = vector.load %arg3[%c0_4, %c0_5] : memref<1x16xf32, #tpu.memory_space<vmem>>, vector<1x16xf32>
    %6 = vector.broadcast %5 : vector<1x16xf32> to vector<256x16xf32>
    %7 = arith.mulf %4, %6 : vector<256x16xf32>
    %cst_6 = arith.constant dense<0.000000e+00> : vector<256xf32>
    %8 = vector.multi_reduction <add>, %7, %cst_6 [1] : vector<256x16xf32> to vector<256xf32>
    %9 = vector.shape_cast %8 : vector<256xf32> to vector<256x1xf32>
    %10 = vector.shape_cast %9 : vector<256x1xf32> to vector<16x16x1xf32>
    %11 = tpu.iota {dimensions = array<i32: 1>} : vector<16x16x1xi32>
    %c0_7 = arith.constant 0 : index
    %c0_8 = arith.constant 0 : index
    %c0_9 = arith.constant 0 : index
    %12 = vector.load %arg4[%c0_7, %c0_8, %c0_9] : memref<16x1x1xi32, #tpu.memory_space<vmem>>, vector<16x1x1xi32>
    %13 = vector.broadcast %12 : vector<16x1x1xi32> to vector<16x16x1xi32>
    %14 = arith.cmpi slt, %11, %13 : vector<16x16x1xi32>
    %cst_10 = arith.constant -1.000000e+09 : f32
    %15 = vector.broadcast %cst_10 : f32 to vector<16x16x1xf32>
    %16 = arith.select %14, %10, %15 : vector<16x16x1xi1>, vector<16x16x1xf32>
    %cst_11 = arith.constant dense<0xFF800000> : vector<16x1xf32>
    %17 = vector.multi_reduction <maximumf>, %16, %cst_11 [1] : vector<16x16x1xf32> to vector<16x1xf32>
    %18 = vector.shape_cast %17 : vector<16x1xf32> to vector<16x1x1xf32>
    %19 = vector.broadcast %18 : vector<16x1x1xf32> to vector<16x16x1xf32>
    %20 = arith.subf %16, %19 : vector<16x16x1xf32>
    %21 = math.exp %20 : vector<16x16x1xf32>
    %cst_12 = arith.constant dense<0.000000e+00> : vector<16x1xf32>
    %22 = vector.multi_reduction <add>, %21, %cst_12 [1] : vector<16x16x1xf32> to vector<16x1xf32>
    %23 = vector.shape_cast %22 : vector<16x1xf32> to vector<16x1x1xf32>
    %24 = tpu.reciprocal %23 {approx = true} : vector<16x1x1xf32> -> vector<16x1x1xf32>
    %25 = vector.broadcast %24 : vector<16x1x1xf32> to vector<16x16x1xf32>
    %26 = arith.mulf %21, %25 : vector<16x16x1xf32>
    %c0_13 = arith.constant 0 : index
    %c0_14 = arith.constant 0 : index
    %c0_15 = arith.constant 0 : index
    %27 = vector.load %arg1[%c0_13, %c0_14, %c0_15] : memref<16x16x32xbf16, #tpu.memory_space<vmem>>, vector<16x16x32xbf16>
    %28 = arith.extf %27 : vector<16x16x32xbf16> to vector<16x16x32xf32>
    %29 = vector.broadcast %26 : vector<16x16x1xf32> to vector<16x16x32xf32>
    %30 = arith.mulf %29, %28 : vector<16x16x32xf32>
    %cst_16 = arith.constant dense<0.000000e+00> : vector<16x32xf32>
    %31 = vector.multi_reduction <add>, %30, %cst_16 [1] : vector<16x16x32xf32> to vector<16x32xf32>
    %c0_17 = arith.constant 0 : index
    %c0_18 = arith.constant 0 : index
    %32 = vector.load %arg5[%c0_17, %c0_18] : memref<16x32xf32, #tpu.memory_space<vmem>>, vector<16x32xf32>
    tpu.vector_store %arg5[%c0_17, %c0_18], %31 {strides = array<i32>} : memref<16x32xf32, #tpu.memory_space<vmem>>, vector<16x32xf32>,
    return
  }
  func.func @transform_0(%arg0: i32) -> (i32, i32, i32) {
    %c0_i32 = arith.constant 0 : i32
    %c0_i32_0 = arith.constant 0 : i32
    %c0_i32_1 = arith.constant 0 : i32
    return %arg0, %c0_i32, %c0_i32_0 : i32, i32, i32
  }
  func.func @transform_1(%arg0: i32) -> (i32, i32) {
    %c0_i32 = arith.constant 0 : i32
    %c0_i32_0 = arith.constant 0 : i32
    %c0_i32_1 = arith.constant 0 : i32
    return %c0_i32, %c0_i32_0 : i32, i32
  }
  func.func @transform_2(%arg0: i32) -> (i32, i32) {
    %c0_i32 = arith.constant 0 : i32
    %c0_i32_0 = arith.constant 0 : i32
    %c0_i32_1 = arith.constant 0 : i32
    return %c0_i32, %c0_i32_0 : i32, i32
  }
  func.func @transform_3(%arg0: i32) -> (i32, i32, i32) {
    %c0_i32 = arith.constant 0 : i32
    %c0_i32_0 = arith.constant 0 : i32
    %c0_i32_1 = arith.constant 0 : i32
    return %arg0, %c0_i32, %c0_i32_0 : i32, i32, i32
  }
  func.func @transform_4(%arg0: i32) -> (i32, i32) {
    %c0_i32 = arith.constant 0 : i32
    %c0_i32_0 = arith.constant 0 : i32
    return %arg0, %c0_i32 : i32, i32
  }
}

</mosaic_0001>

<bundles_post_ra>
// kernel: tpu_custom_call.1
= control target key start
LH: loop header
LB: loop body
LE: loop exit
PB: predicated region body
PF: predicated region fallthrough
CT: control target
= control target key end

     0   :  { %9 = vsyncpa [#allocation3], 0  ;;  %s2564_s0 = inlined_call_operand.hbm [shape: bf16[16,16,32], index: 0, kind: input, shape index: {}]   ;;  %s2565_s1 = inlined_call_operand.vmem [shape: bf16[32,16], index: 1, kind: input, shape index: {}]   ;;  %s2566_s2 = inlined_call_operand.vmem [shape: f32[1,16], index: 2, kind: input, shape index: {}]   ;;  %s2567_s3 = inlined_call_operand.vmem [shape: s32[16,1,1], index: 3, kind: input, shape index: {}]   ;;  %s2568_s4 = inlined_call_operand.hbm [shape: f32[16,32], index: 4, kind: output, shape index: {}]  }
   0x1   :  { %10 = vsyncpa [#allocation4], 0  ;;  %s15_s17 = sshll.u32 %s2564_s0, 4  ;;  %s1777_s18 = smov [#allocation2]   ;;  %s16_s17 = int_to_ptr.hbm [resolvable:$true] %s15_s17 }
   0x2   :  { %s17_s19 = sshll.u32 %s1777_s18, 4  ;;  %s1778_s20 = smov 64   ;;  %s18_s19 = int_to_ptr.vmem [resolvable:$true] %s17_s19 }
   0x3   :  { %s1779_s21 = smov 4  }
   0x4   :  { %23 = dma.hbm_to_vmem [thread:$0]  %s16_s17, 2048, %s18_s19, [#allocation3], %s1778_s20, %s1778_s20, %s1779_s21  }
   0x5   :  { %1773 = dma.done.wait [#allocation3], 2048  }
   0x6   :  { %1774 = vsyncadd [#allocation3], 4294965248  ;;  %v1531_v0 = vld [vmem:[%s2565_s1 + $0x8] sm:$0xff]  ;;  %v1530_v1 = vld [vmem:[%s2565_s1] sm:$0xff]  ;;  %vm163_vm0 = vcmask 261120   ;;  %vm369_vm1 = vcmask 130048  }
   0x7   :  { %218 = vmatpush.bf16.msra.mxu0 %v1531_v0  ;;  %1533 = vmatpush.bf16.msra.mxu2 %v1531_v0  ;;  %v1514_v2 = vld [vmem:[#allocation2] sm:$0xff]  ;;  %v1515_v6 = vld [vmem:[#allocation2 + $0x8] sm:$0xff]  ;;  %v1516_v10 = vld [vmem:[#allocation2 + $0x10] sm:$0xff]  ;;  %vm565_vm6 = vcmask 7168   ;;  %s1413_s5 = sshll.u32 %s2568_s4, 4  ;;  %s1782_s6 = smov 128   ;;  %s1414_s5 = int_to_ptr.hbm [resolvable:$true] %s1413_s5 }
   0x8   :  { %1534 = vmatpush.bf16.msra.mxu3 %v1531_v0  ;;  %1532 = vmatpush.bf16.msra.mxu1 %v1531_v0  ;;  %v1522_v3 = vld [vmem:[#allocation2 + $0x40] sm:$0xff]  ;;  %v1523_v7 = vld [vmem:[#allocation2 + $0x48] sm:$0xff]  ;;  %v1524_v11 = vld [vmem:[#allocation2 + $0x50] sm:$0xff]  ;;  %s1783_s7 = smov 8  }
   0x9   :  { %v1526_v4 = vld [vmem:[#allocation2 + $0x60] sm:$0xff]  ;;  %v1527_v8 = vld [vmem:[#allocation2 + $0x68] sm:$0xff]  ;;  %v1520_v12 = vld [vmem:[#allocation2 + $0x30] sm:$0xff] }
   0xa   :  { %v1518_v5 = vld [vmem:[#allocation2 + $0x20] sm:$0xff]  ;;  %v1519_v9 = vld [vmem:[#allocation2 + $0x28] sm:$0xff]  ;;  %v1528_v13 = vld [vmem:[#allocation2 + $0x70] sm:$0xff] }
   0xb   :  { %219 = vmatpush.bf16.msra.mxu0 %v1530_v1  ;;  %1536 = vmatpush.bf16.msra.mxu2 %v1530_v1  ;;  %v1517_v14 = vld [vmem:[#allocation2 + $0x18] sm:$0xff]  ;;  %v1837_v20 = vld [vmem:[%s2566_s2] ss:$0 sm:$0xff] }
   0xc   :  { %1537 = vmatpush.bf16.msra.mxu3 %v1530_v1  ;;  %1535 = vmatpush.bf16.msra.mxu1 %v1530_v1  ;;  %v1525_v15 = vld [vmem:[#allocation2 + $0x58] sm:$0xff] }
   0xd   :  { %v1529_v16 = vld [vmem:[#allocation2 + $0x78] sm:$0xff] }
   0xe   :  { %1498 = vmatmul.msk.bf16.vlgmr.msra.gmra.mxu0 %vm163_vm0, %v1514_v2  ;;  %1506 = vmatmul.msk.bf16.vlgmr.msra.gmra.mxu2 %vm163_vm0, %v1522_v3  ;;  %v1521_v17 = vld [vmem:[#allocation2 + $0x38] sm:$0xff] }
   0xf   :  { %1510 = vmatmul.msk.bf16.vlgmr.msra.gmra.mxu3 %vm163_vm0, %v1526_v4  ;;  %1502 = vmatmul.msk.bf16.vlgmr.msra.gmra.mxu1 %vm163_vm0, %v1518_v5 }
  0x1e   :  { %1499 = vmatmul.msk.bf16.gmra.mxu0 %vm163_vm0, %v1515_v6  ;;  %1507 = vmatmul.msk.bf16.gmra.mxu2 %vm163_vm0, %v1523_v7 }
  0x1f   :  { %1511 = vmatmul.msk.bf16.gmra.mxu3 %vm163_vm0, %v1527_v8  ;;  %1503 = vmatmul.msk.bf16.gmra.mxu1 %vm163_vm0, %v1519_v9 }
  0x2e   :  { %1500 = vmatmul.msk.bf16.gmra.mxu0 %vm163_vm0, %v1516_v10  ;;  %1508 = vmatmul.msk.bf16.gmra.mxu2 %vm163_vm0, %v1524_v11 }
  0x2f   :  { %1504 = vmatmul.msk.bf16.gmra.mxu1 %vm163_vm0, %v1520_v12  ;;  %1512 = vmatmul.msk.bf16.gmra.mxu3 %vm163_vm0, %v1528_v13 }
  0x3e   :  { %1501 = vmatmul.msk.bf16.gmra.mxu0 %vm163_vm0, %v1517_v14  ;;  %1509 = vmatmul.msk.bf16.gmra.mxu2 %vm163_vm0, %v1525_v15 }
  0x3f   :  { %1513 = vmatmul.msk.bf16.gmra.mxu3 %vm163_vm0, %v1529_v16  ;;  %1505 = vmatmul.msk.bf16.gmra.mxu1 %vm163_vm0, %v1521_v17 }
  0x8b   :  { %v221_v18 = vpop.f32.mrf.mxu0 }
  0x8c   :  { %1565 = vtanh.f32 %v221_v18  ;;  %v241_v19 = vpop.f32.mrf.mxu1 }
  0x8d   :  { %1567 = vtanh.f32 %v241_v19 }
  0x91   :  { %v261_v21 = vpop.f32.mrf.mxu2 }
  0x92   :  { %v1566_v22 = vpop.eup %1565  ;;  %1569 = vtanh.f32 %v261_v21  ;;  %v281_v23 = vpop.f32.mrf.mxu3 }
  0x93   :  { %v1568_v24 = vpop.eup %1567  ;;  %1571 = vtanh.f32 %v281_v23  ;;  %v223_v25 = vpop.f32.mrf.mxu0  ;;  %v337_v26 = vmul.f32 %v1566_v22, %v1837_v20 }
  0x94   :  { %v243_v27 = vpop.f32.mrf.mxu1  ;;  %v345_v28 = vmul.f32 %v1568_v24, %v1837_v20  ;;  %1573 = vtanh.f32 %v223_v25 }
  0x95   :  { %v370_v29 = vsel %vm369_vm1, %v337_v26, 0.0 }
  0x96   :  { %371 = vadd.xlane.f32.xlu0 %v370_v29  ;;  %v394_v30 = vsel %vm369_vm1, %v345_v28, 0.0 }
  0x97   :  { %395 = vadd.xlane.f32.xlu2 %v394_v30 }
  0x98   :  { %v1570_v31 = vpop.eup %1569 }
  0x99   :  { %v1572_v32 = vpop.eup %1571  ;;  %v263_v33 = vpop.f32.mrf.mxu2  ;;  %v353_v34 = vmul.f32 %v1570_v31, %v1837_v20 }
  0x9a   :  { %1575 = vtanh.f32 %v263_v33  ;;  %v283_v35 = vpop.f32.mrf.mxu3  ;;  %v361_v36 = vmul.f32 %v1572_v32, %v1837_v20  ;;  %v1574_v41 = vpop.eup %1573 }
  0x9b   :  { %1577 = vtanh.f32 %v283_v35  ;;  %v226_v37 = vpop.f32.mrf.mxu0  ;;  %v418_v38 = vsel %vm369_vm1, %v353_v34, 0.0  ;;  %v338_v45 = vmul.f32 %v1574_v41, %v1837_v20 }
  0x9c   :  { %419 = vadd.xlane.f32.xlu1 %v418_v38  ;;  %v246_v39 = vpop.f32.mrf.mxu1  ;;  %1579 = vtanh.f32 %v226_v37  ;;  %v442_v40 = vsel %vm369_vm1, %v361_v36, 0.0 }
  0x9d   :  { %1581 = vtanh.f32 %v243_v27  ;;  %v373_v54 = vsel %vm369_vm1, %v338_v45, 0.0 }
  0x9e   :  { %443 = vadd.xlane.f32.xlu0 %v442_v40 }
  0xa0   :  { %v1576_v42 = vpop.eup %1575 }
  0xa1   :  { %v1578_v43 = vpop.eup %1577  ;;  %v354_v44 = vmul.f32 %v1576_v42, %v1837_v20  ;;  %v266_v46 = vpop.f32.mrf.mxu2 }
  0xa2   :  { %v286_v47 = vpop.f32.mrf.mxu3  ;;  %v362_v48 = vmul.f32 %v1578_v43, %v1837_v20  ;;  %v1580_v49 = vpop.eup %1579 }
  0xa3   :  { %1583 = vtanh.f32 %v286_v47  ;;  %v228_v50 = vpop.f32.mrf.mxu0  ;;  %v421_v51 = vsel %vm369_vm1, %v354_v44, 0.0  ;;  %v1582_v55 = vpop.eup %1581  ;;  %v339_v56 = vmul.f32 %v1580_v49, %v1837_v20 }
  0xa4   :  { %1585 = vtanh.f32 %v246_v39  ;;  %v445_v52 = vsel %vm369_vm1, %v362_v48, 0.0  ;;  %422 = vadd.xlane.f32.xlu2 %v421_v51  ;;  %v248_v53 = vpop.f32.mrf.mxu1  ;;  %v346_v58 = vmul.f32 %v1582_v55, %v1837_v20 }
  0xa5   :  { %446 = vadd.xlane.f32.xlu1 %v445_v52  ;;  %1587 = vtanh.f32 %v248_v53  ;;  %v376_v63 = vsel %vm369_vm1, %v339_v56, 0.0 }
  0xa6   :  { %374 = vadd.xlane.f32.xlu0 %v373_v54  ;;  %1589 = vtanh.f32 %v266_v46  ;;  %v397_v5 = vsel %vm369_vm1, %v346_v58, 0.0 }
  0xa9   :  { %v1584_v57 = vpop.eup %1583  ;;  %v268_v59 = vpop.f32.mrf.mxu2 }
  0xaa   :  { %v1586_v60 = vpop.eup %1585  ;;  %v288_v61 = vpop.f32.mrf.mxu3  ;;  %v363_v62 = vmul.f32 %v1584_v57, %v1837_v20 }
  0xab   :  { %v1588_v0 = vpop.eup %1587  ;;  %v231_v1 = vpop.f32.mrf.mxu0  ;;  %v347_v7 = vmul.f32 %v1586_v60, %v1837_v20 }
  0xac   :  { %v1590_v2 = vpop.eup %1589  ;;  %v448_v3 = vsel %vm369_vm1, %v363_v62, 0.0  ;;  %v251_v4 = vpop.f32.mrf.mxu1  ;;  %1591 = vtanh.f32 %v231_v1  ;;  %v348_v6 = vmul.f32 %v1588_v0, %v1837_v20 }
  0xad   :  { %449 = vadd.xlane.f32.xlu2 %v448_v3  ;;  %377 = vadd.xlane.f32.xlu1 %v376_v63  ;;  %1593 = vtanh.f32 %v228_v50  ;;  %v355_v8 = vmul.f32 %v1590_v2, %v1837_v20  ;;  %v400_v11 = vsel %vm369_vm1, %v347_v7, 0.0 }
  0xae   :  { %398 = vadd.xlane.f32.xlu0 %v397_v5  ;;  %1595 = vtanh.f32 %v288_v61  ;;  %v403_v10 = vsel %vm369_vm1, %v348_v6, 0.0 }
  0xaf   :  { %v424_v14 = vsel %vm369_vm1, %v355_v8, 0.0 }
  0xb1   :  { %v271_v9 = vpop.f32.mrf.mxu2 }
  0xb2   :  { %v291_v12 = vpop.f32.mrf.mxu3  ;;  %v1592_v13 = vpop.eup %1591  ;;  %1597 = vtanh.f32 %v271_v9 }
  0xb3   :  { %v233_v15 = vpop.f32.mrf.mxu0  ;;  %v1594_v17 = vpop.eup %1593  ;;  %1599 = vtanh.f32 %v251_v4  ;;  %v341_v19 = vmul.f32 %v1592_v13, %v1837_v20 }
  0xb4   :  { %v253_v16 = vpop.f32.mrf.mxu1  ;;  %v1596_v18 = vpop.eup %1595  ;;  %1601 = vtanh.f32 %v268_v59  ;;  %v340_v21 = vmul.f32 %v1594_v17, %v1837_v20 }
  0xb5   :  { %404 = vadd.xlane.f32.xlu2 %v403_v10  ;;  %401 = vadd.xlane.f32.xlu1 %v400_v11  ;;  %v364_v22 = vmul.f32 %v1596_v18, %v1837_v20  ;;  %v382_v24 = vsel %vm369_vm1, %v341_v19, 0.0  ;;  %1603 = vtanh.f32 %v291_v12 }
  0xb6   :  { %425 = vadd.xlane.f32.xlu0 %v424_v14  ;;  %v379_v29 = vsel %vm369_vm1, %v340_v21, 0.0 }
  0xb7   :  { %v451_v32 = vsel %vm369_vm1, %v364_v22, 0.0  ;;  %v466_v22 = vlaneseq }
  0xb8   :  { %v1598_v26 = vpop.eup %1597 }
  0xb9   :  { %v273_v23 = vpop.f32.mrf.mxu2  ;;  %v1600_v28 = vpop.eup %1599  ;;  %v357_v33 = vmul.f32 %v1598_v26, %v1837_v20  ;;  %v1552_v26 = vld [vmem:[%s2567_s3 + $0xc] ss:$0 sm:$0xff] }
  0xba   :  { %v293_v25 = vpop.f32.mrf.mxu3  ;;  %v1602_v31 = vpop.eup %1601  ;;  %v349_v34 = vmul.f32 %v1600_v28, %v1837_v20 }
  0xbb   :  { %v236_v27 = vpop.f32.mrf.mxu0  ;;  %v356_v35 = vmul.f32 %v1602_v31, %v1837_v20  ;;  %v1604_v36 = vpop.eup %1603  ;;  %v430_v39 = vsel %vm369_vm1, %v357_v33, 0.0 }
  0xbc   :  { %1605 = vtanh.f32 %v236_v27  ;;  %v256_v30 = vpop.f32.mrf.mxu1  ;;  %v406_v42 = vsel %vm369_vm1, %v349_v34, 0.0  ;;  %v365_v51 = vmul.f32 %v1604_v36, %v1837_v20  ;;  %v1549_v27 = vld [vmem:[%s2567_s3] ss:$0 sm:$0xff] }
  0xbd   :  { %380 = vadd.xlane.f32.xlu1 %v379_v29  ;;  %383 = vadd.xlane.f32.xlu2 %v382_v24  ;;  %1607 = vtanh.f32 %v256_v30  ;;  %v427_v45 = vsel %vm369_vm1, %v356_v35, 0.0  ;;  %v1550_v24 = vld [vmem:[%s2567_s3 + $0x8] ss:$0 sm:$0xff] }
  0xbe   :  { %452 = vadd.xlane.f32.xlu0 %v451_v32  ;;  %1609 = vtanh.f32 %v233_v15  ;;  %v454_v61 = vsel %vm369_vm1, %v365_v51, 0.0 }
  0xbf   :  { %1611 = vtanh.f32 %v273_v23 }
  0xc0   :  { %1613 = vtanh.f32 %v293_v25 }
  0xc1   :  { %v276_v37 = vpop.f32.mrf.mxu2 }
  0xc2   :  { %v1606_v38 = vpop.eup %1605  ;;  %v296_v40 = vpop.f32.mrf.mxu3  ;;  %1615 = vtanh.f32 %v276_v37 }
  0xc3   :  { %v1608_v41 = vpop.eup %1607  ;;  %v238_v43 = vpop.f32.mrf.mxu0  ;;  %1617 = vtanh.f32 %v296_v40  ;;  %v343_v44 = vmul.f32 %v1606_v38, %v1837_v20  ;;  %v1551_v40 = vld [vmem:[%s2567_s3 + $0x4] ss:$0 sm:$0xff] }
  0xc4   :  { %1619 = vtanh.f32 %v238_v43  ;;  %v258_v46 = vpop.f32.mrf.mxu1  ;;  %v351_v47 = vmul.f32 %v1608_v41, %v1837_v20  ;;  %v1610_v48 = vpop.eup %1609 }
  0xc5   :  { %428 = vadd.xlane.f32.xlu1 %v427_v45  ;;  %431 = vadd.xlane.f32.xlu2 %v430_v39  ;;  %v388_v49 = vsel %vm369_vm1, %v343_v44, 0.0  ;;  %1621 = vtanh.f32 %v258_v46  ;;  %v1612_v50 = vpop.eup %1611  ;;  %v342_v55 = vmul.f32 %v1610_v48, %v1837_v20 }
  0xc6   :  { %407 = vadd.xlane.f32.xlu0 %v406_v42  ;;  %v412_v52 = vsel %vm369_vm1, %v351_v47, 0.0  ;;  %v1614_v53 = vpop.eup %1613  ;;  %1623 = vtanh.f32 %v253_v16  ;;  %v358_v57 = vmul.f32 %v1612_v50, %v1837_v20 }
  0xc7   :  { %v385_v3 = vsel %vm369_vm1, %v342_v55, 0.0  ;;  %v366_v9 = vmul.f32 %v1614_v53, %v1837_v20 }
  0xc8   :  { %v1616_v54 = vpop.eup %1615  ;;  %v433_v7 = vsel %vm369_vm1, %v358_v57, 0.0 }
  0xc9   :  { %v1618_v56 = vpop.eup %1617  ;;  %v278_v58 = vpop.f32.mrf.mxu2  ;;  %v359_v59 = vmul.f32 %v1616_v54, %v1837_v20  ;;  %v457_v15 = vsel %vm369_vm1, %v366_v9, 0.0 }
  0xca   :  { %v1620_v60 = vpop.eup %1619  ;;  %v298_v62 = vpop.f32.mrf.mxu3  ;;  %1625 = vtanh.f32 %v278_v58  ;;  %v367_v63 = vmul.f32 %v1618_v56, %v1837_v20 }
  0xcb   :  { %v1622_v0 = vpop.eup %1621  ;;  %1627 = vtanh.f32 %v298_v62  ;;  %v436_v1 = vsel %vm369_vm1, %v359_v59, 0.0  ;;  %v344_v2 = vmul.f32 %v1620_v60, %v1837_v20 }
  0xcc   :  { %v460_v4 = vsel %vm369_vm1, %v367_v63, 0.0  ;;  %v352_v5 = vmul.f32 %v1622_v0, %v1837_v20  ;;  %v1624_v6 = vpop.eup %1623  ;;  %v1555_v63 = vld [vmem:[%s2567_s3 + $0x5] ss:$0 sm:$0xff] }
  0xcd   :  { %455 = vadd.xlane.f32.xlu1 %v454_v61  ;;  %386 = vadd.xlane.f32.xlu2 %v385_v3  ;;  %v391_v8 = vsel %vm369_vm1, %v344_v2, 0.0  ;;  %v350_v12 = vmul.f32 %v1624_v6, %v1837_v20 }
  0xce   :  { %434 = vadd.xlane.f32.xlu0 %v433_v7  ;;  %v415_v10 = vsel %vm369_vm1, %v352_v5, 0.0 }
  0xcf   :  { %v409_v18 = vsel %vm369_vm1, %v350_v12, 0.0 }
  0xd0   :  { %v1626_v11 = vpop.eup %1625 }
  0xd1   :  { %v1628_v13 = vpop.eup %1627  ;;  %v360_v14 = vmul.f32 %v1626_v11, %v1837_v20 }
  0xd2   :  { %v368_v16 = vmul.f32 %v1628_v13, %v1837_v20  ;;  %v1903_v20 = vshrl.u32 %v466_v22, 7 }
  0xd3   :  { %v439_v17 = vsel %vm369_vm1, %v360_v14, 0.0 }
  0xd4   :  { %v463_v19 = vsel %vm369_vm1, %v368_v16, 0.0  ;;  %v1915_v29 = vadd.s32 8, %v1903_v20  ;;  %vm517_vm2 = vcmp.lt.s32.totalorder %v1903_v20, %v1550_v24  ;;  %vm525_vm3 = vcmp.lt.s32.totalorder %v1903_v20, %v1552_v26  ;;  %v1554_v16 = vld [vmem:[%s2567_s3 + $0x1] ss:$0 sm:$0xff] }
  0xd5   :  { %410 = vadd.xlane.f32.xlu1 %v409_v18  ;;  %458 = vadd.xlane.f32.xlu2 %v457_v15  ;;  %vm501_vm4 = vcmp.lt.s32.totalorder %v1903_v20, %v1549_v27  ;;  %vm509_vm9 = vcmp.lt.s32.totalorder %v1903_v20, %v1551_v40  ;;  %vm511_vm13 = vcmp.lt.s32.totalorder %v1903_v20, %v1555_v63 }
  0xd6   :  { %389 = vadd.xlane.f32.xlu0 %v388_v49  ;;  %vm518_vm5 = vcmp.lt.s32.totalorder %v1915_v29, %v1550_v24  ;;  %vm526_vm7 = vcmp.lt.s32.totalorder %v1915_v29, %v1552_v26  ;;  %vm502_vm8 = vcmp.lt.s32.totalorder %v1915_v29, %v1549_v27  ;;  %vm510_vm10 = vcmp.lt.s32.totalorder %v1915_v29, %v1551_v40  ;;  %v1994_v40 = vld [vmem:[%s2567_s3 + $0x2] ss:$0 sm:$0xff] }
  0xd7   :  { %vm512_vm11 = vcmp.lt.s32.totalorder %v1915_v29, %v1555_v63  ;;  %vm503_vm14 = vcmp.lt.s32.totalorder %v1903_v20, %v1554_v16  ;;  %vm504_vm15 = vcmp.lt.s32.totalorder %v1915_v29, %v1554_v16 }
  0xdd   :  { %437 = vadd.xlane.f32.xlu1 %v436_v1  ;;  %413 = vadd.xlane.f32.xlu2 %v412_v52  ;;  %v1954_v1 = vld [vmem:[%s2567_s3 + $0xd] ss:$0 sm:$0xff] }
  0xde   :  { %461 = vadd.xlane.f32.xlu0 %v460_v4  ;;  %vm527_vm12 = vcmp.lt.s32.totalorder %v1903_v20, %v1954_v1  ;;  %vm528_vm1 = vcmp.lt.s32.totalorder %v1915_v29, %v1954_v1 }
  0xe5   :  { %440 = vadd.xlane.f32.xlu2 %v439_v17  ;;  %392 = vadd.xlane.f32.xlu1 %v391_v8 }
  0xe6   :  { %416 = vadd.xlane.f32.xlu0 %v415_v10 }
  0xed   :  { %464 = vadd.xlane.f32.xlu1 %v463_v19 }
 0x109   :  { %v372_v21 = vpop.xlane.xlu0 %371 }
 0x10a   :  { %v396_v23 = vpop.xlane.xlu2 %395  ;;  %v1927_v33 = vsel %vm501_vm4, %v372_v21, -1e+09  ;;  %vm505_vm4 = vcmp.lt.s32.totalorder %v1903_v20, %v1994_v40 }
 0x10b   :  { %v566_v45 = vsel %vm565_vm6, %v1927_v33, -inf  ;;  %v1946_v58 = vsel %vm509_vm9, %v396_v23, -1e+09 }
 0x10c   :  { %v602_v3 = vsel %vm565_vm6, %v1946_v58, -inf }
 0x10f   :  { %v420_v25 = vpop.xlane.xlu1 %419 }
 0x110   :  { %v1921_v30 = vsel %vm517_vm2, %v420_v25, -1e+09 }
 0x111   :  { %v444_v28 = vpop.xlane.xlu0 %443  ;;  %v638_v36 = vsel %vm565_vm6, %v1921_v30, -inf }
 0x112   :  { %v1924_v31 = vsel %vm525_vm3, %v444_v28, -1e+09 }
 0x113   :  { %v674_v41 = vsel %vm565_vm6, %v1924_v31, -inf }
 0x117   :  { %v423_v32 = vpop.xlane.xlu2 %422 }
 0x118   :  { %v447_v34 = vpop.xlane.xlu1 %446  ;;  %v550_v35 = vsel %vm518_vm5, %v423_v32, -1e+09 }
 0x119   :  { %v558_v37 = vsel %vm526_vm7, %v447_v34, -1e+09  ;;  %v639_v38 = vsel %vm565_vm6, %v550_v35, -inf  ;;  %v375_v39 = vpop.xlane.xlu0 %374 }
 0x11a   :  { %v675_v42 = vsel %vm565_vm6, %v558_v37, -inf  ;;  %v640_v43 = vmax.f32 %v638_v36, %v639_v38  ;;  %v1938_v44 = vsel %vm502_vm8, %v375_v39, -1e+09  ;;  %vm506_vm8 = vcmp.lt.s32.totalorder %v1915_v29, %v1994_v40 }
 0x11b   :  { %v676_v46 = vmax.f32 %v674_v41, %v675_v42  ;;  %v567_v47 = vsel %vm565_vm6, %v1938_v44, -inf }
 0x11c   :  { %v641_v48 = vrot.slane %v640_v43, 4  ;;  %v568_v49 = vmax.f32 %v566_v45, %v567_v47 }
 0x11d   :  { %v677_v50 = vrot.slane %v676_v46, 4 }
 0x11e   :  { %v642_v51 = vmax.f32 %v640_v43, %v641_v48  ;;  %v569_v52 = vrot.slane %v568_v49, 4 }
 0x11f   :  { %v678_v53 = vmax.f32 %v676_v46, %v677_v50 }
 0x120   :  { %v643_v54 = vrot.slane %v642_v51, 2  ;;  %v570_v55 = vmax.f32 %v568_v49, %v569_v52  ;;  %v450_v56 = vpop.xlane.xlu2 %449  ;;  %v378_v57 = vpop.xlane.xlu1 %377  ;;  %v2021_v52 = vld [vmem:[%s2567_s3 + $0xa] ss:$0 sm:$0xff] }
 0x121   :  { %v679_v59 = vrot.slane %v678_v53, 2  ;;  %v399_v60 = vpop.xlane.xlu0 %398  ;;  %v1999_v41 = vsel %vm527_vm12, %v450_v56, -1e+09  ;;  %v2002_v43 = vsel %vm503_vm14, %v378_v57, -1e+09  ;;  %vm521_vm5 = vcmp.lt.s32.totalorder %v1903_v20, %v2021_v52 }
 0x122   :  { %v644_v61 = vmax.f32 %v642_v51, %v643_v54  ;;  %v571_v62 = vrot.slane %v570_v55, 2  ;;  %v1956_v2 = vsel %vm510_vm10, %v399_v60, -1e+09  ;;  %v683_v48 = vsel %vm565_vm6, %v1999_v41, -inf }
 0x123   :  { %v680_v0 = vmax.f32 %v678_v53, %v679_v59  ;;  %v603_v6 = vsel %vm565_vm6, %v1956_v2, -inf  ;;  %v575_v54 = vsel %vm565_vm6, %v2002_v43, -inf  ;;  %vm522_vm10 = vcmp.lt.s32.totalorder %v1915_v29, %v2021_v52 }
 0x124   :  { %v645_v4 = vrot.slane %v644_v61, 1  ;;  %v572_v5 = vmax.f32 %v570_v55, %v571_v62  ;;  %v604_v8 = vmax.f32 %v602_v3, %v603_v6 }
 0x125   :  { %v681_v7 = vrot.slane %v680_v0, 1 }
 0x126   :  { %v646_v9 = vmax.f32 %v644_v61, %v645_v4  ;;  %v573_v10 = vrot.slane %v572_v5, 1  ;;  %v605_v12 = vrot.slane %v604_v8, 4 }
 0x127   :  { %v682_v11 = vmax.f32 %v680_v0, %v681_v7 }
 0x128   :  { %v726_v13 = vsub.f32 %v1921_v30, %v646_v9  ;;  %v727_v14 = vsub.f32 %v550_v35, %v646_v9  ;;  %v574_v15 = vmax.f32 %v572_v5, %v573_v10  ;;  %v405_v17 = vpop.xlane.xlu2 %404  ;;  %v402_v18 = vpop.xlane.xlu1 %401  ;;  %v606_v22 = vmax.f32 %v604_v8, %v605_v12 }
 0x129   :  { %v734_v19 = vsub.f32 %v1924_v31, %v682_v11  ;;  %v735_v21 = vsub.f32 %v558_v37, %v682_v11  ;;  %v1971_v23 = vsel %vm512_vm11, %v405_v17, -1e+09  ;;  %v1973_v24 = vpop.xlane.xlu0 %425  ;;  %v1982_v36 = vsel %vm511_vm13, %v402_v18, -1e+09 }
 0x12a   :  { %v774_v25 = vmul.f32 1.442695, %v726_v13  ;;  %v776_v26 = vmul.f32 1.442695, %v727_v14  ;;  %v710_v27 = vsub.f32 %v1927_v33, %v574_v15  ;;  %v711_v28 = vsub.f32 %v1938_v44, %v574_v15  ;;  %v1987_v33 = vld [vmem:[%s2567_s3 + $0x9] ss:$0 sm:$0xff] }
 0x12b   :  { %v790_v30 = vmul.f32 1.442695, %v734_v19  ;;  %v792_v32 = vmul.f32 1.442695, %v735_v21  ;;  %v607_v34 = vrot.slane %v606_v22, 2  ;;  %v612_v35 = vsel %vm565_vm6, %v1971_v23, -inf }
 0x12c   :  { %1629 = vpow2.f32 %v774_v25  ;;  %v742_v31 = vmul.f32 1.442695, %v710_v27  ;;  %v744_v37 = vmul.f32 1.442695, %v711_v28  ;;  %v611_v39 = vsel %vm565_vm6, %v1982_v36, -inf }
 0x12d   :  { %1631 = vpow2.f32 %v790_v30  ;;  %v608_v38 = vmax.f32 %v606_v22, %v607_v34  ;;  %v613_v42 = vmax.f32 %v611_v39, %v612_v35  ;;  %vm519_vm2 = vcmp.lt.s32.totalorder %v1903_v20, %v1987_v33  ;;  %v2059_v14 = vld [vmem:[%s2567_s3 + $0x6] ss:$0 sm:$0xff]  ;;  %v2072_v19 = vld [vmem:[%s2567_s3 + $0xe] ss:$0 sm:$0xff] }
 0x12e   :  { %1633 = vpow2.f32 %v792_v32  ;;  %vm520_vm3 = vcmp.lt.s32.totalorder %v1915_v29, %v1987_v33  ;;  %v2067_v17 = vsel %vm519_vm2, %v1973_v24, -1e+09  ;;  %vm513_vm7 = vcmp.lt.s32.totalorder %v1903_v20, %v2059_v14 }
 0x12f   :  { %1635 = vpow2.f32 %v776_v26  ;;  %v609_v44 = vrot.slane %v608_v38, 1  ;;  %v614_v45 = vrot.slane %v613_v42, 4  ;;  %v647_v35 = vsel %vm565_vm6, %v2067_v17, -inf }
 0x130   :  { %1637 = vpow2.f32 %v742_v31  ;;  %v381_v46 = vpop.xlane.xlu1 %380  ;;  %v2008_v47 = vpop.xlane.xlu2 %383  ;;  %vm529_vm9 = vcmp.lt.s32.totalorder %v1903_v20, %v2072_v19  ;;  %vm514_vm11 = vcmp.lt.s32.totalorder %v1915_v29, %v2059_v14  ;;  %vm530_vm12 = vcmp.lt.s32.totalorder %v1915_v29, %v2072_v19 }
 0x131   :  { %1639 = vpow2.f32 %v744_v37  ;;  %v610_v49 = vmax.f32 %v608_v38, %v609_v44  ;;  %v2014_v50 = vsel %vm504_vm15, %v381_v46, -1e+09  ;;  %v453_v51 = vpop.xlane.xlu0 %452  ;;  %v615_v55 = vmax.f32 %v613_v42, %v614_v45 }
 0x132   :  { %v2023_v53 = vpop.eup %1629  ;;  %v576_v56 = vsel %vm565_vm6, %v2014_v50, -inf  ;;  %v2032_v57 = vsel %vm528_vm1, %v453_v51, -1e+09  ;;  %v2097_v33 = vsel %vm505_vm4, %v2008_v47, -1e+09 }
 0x133   :  { %v2034_v59 = vpop.eup %1631  ;;  %v878_v60 = vsel %vm565_vm6, %v2023_v53, 0.0  ;;  %v718_v61 = vsub.f32 %v1946_v58, %v610_v49  ;;  %v719_v62 = vsub.f32 %v1956_v2, %v610_v49  ;;  %v577_v63 = vmax.f32 %v575_v54, %v576_v56 }
 0x134   :  { %v2040_v0 = vpop.eup %1633  ;;  %v914_v3 = vsel %vm565_vm6, %v2034_v59, 0.0  ;;  %v616_v4 = vrot.slane %v615_v55, 2  ;;  %v684_v1 = vsel %vm565_vm6, %v2032_v57, -inf  ;;  %v1780_v2 = vmov 0  }
 0x135   :  { %v2046_v5 = vpop.eup %1635  ;;  %v915_v6 = vsel %vm565_vm6, %v2040_v0, 0.0  ;;  %v758_v7 = vmul.f32 1.442695, %v718_v61  ;;  %v760_v8 = vmul.f32 1.442695, %v719_v62  ;;  %v578_v58 = vrot.slane %v577_v63, 4  ;;  %1547 = vset.pattern.permute.xlu1 %v1780_v2  ;;  %1546 = vset.pattern.permute.xlu0 %v1780_v2 }
 0x136   :  { %v2052_v9 = vpop.eup %1637  ;;  %v916_v10 = vadd.f32 %v915_v6, %v914_v3  ;;  %v879_v11 = vsel %vm565_vm6, %v2046_v5, 0.0  ;;  %v617_v12 = vmax.f32 %v615_v55, %v616_v4  ;;  %v685_v13 = vmax.f32 %v683_v48, %v684_v1  ;;  %1545 = vset.pattern.permute.xlu2 %v1780_v2 }
 0x137   :  { %v2061_v15 = vpop.eup %1639  ;;  %v880_v16 = vadd.f32 %v879_v11, %v878_v60  ;;  %1641 = vpow2.f32 %v758_v7  ;;  %v579_v18 = vmax.f32 %v577_v63, %v578_v58  ;;  %v806_v21 = vsel %vm565_vm6, %v2052_v9, 0.0 }
 0x138   :  { %v807_v22 = vsel %vm565_vm6, %v2061_v15, 0.0  ;;  %1643 = vpow2.f32 %v760_v8  ;;  %v618_v25 = vrot.slane %v617_v12, 1  ;;  %v429_v26 = vpop.xlane.xlu1 %428  ;;  %v432_v27 = vpop.xlane.xlu2 %431  ;;  %v917_v28 = vrot.slane %v916_v10, 4 }
 0x139   :  { %v881_v30 = vrot.slane %v880_v16, 4  ;;  %v580_v24 = vrot.slane %v579_v18, 2  ;;  %v686_v32 = vrot.slane %v685_v13, 4  ;;  %v2083_v31 = vsel %vm520_vm3, %v429_v26, -1e+09  ;;  %v408_v42 = vpop.xlane.xlu0 %407 }
 0x13a   :  { %v619_v34 = vmax.f32 %v617_v12, %v618_v25  ;;  %v808_v37 = vadd.f32 %v807_v22, %v806_v21  ;;  %v648_v46 = vsel %vm565_vm6, %v2083_v31, -inf  ;;  %v2103_v49 = vadd.f32 %v917_v28, %v916_v10 }
 0x13b   :  { %v581_v38 = vmax.f32 %v579_v18, %v580_v24  ;;  %v687_v39 = vmax.f32 %v685_v13, %v686_v32  ;;  %v2105_v51 = vadd.f32 %v881_v30, %v880_v16  ;;  %v649_v60 = vmax.f32 %v647_v35, %v648_v46 }
 0x13c   :  { %v720_v44 = vsub.f32 %v1982_v36, %v619_v34  ;;  %v721_v45 = vsub.f32 %v1971_v23, %v619_v34  ;;  %v809_v61 = vrot.slane %v808_v37, 4  ;;  %v2120_v6 = vsel %vm521_vm5, %v432_v27, -1e+09 }
 0x13d   :  { %v2101_v48 = vpop.eup %1641  ;;  %v582_v54 = vrot.slane %v581_v38, 1  ;;  %v688_v55 = vrot.slane %v687_v39, 2  ;;  %v650_v1 = vrot.slane %v649_v60, 4  ;;  %v919_v11 = vrot.slane %v2103_v49, 2 }
 0x13e   :  { %v2109_v23 = vpop.eup %1643  ;;  %v842_v36 = vsel %vm565_vm6, %v2101_v48, 0.0  ;;  %v762_v47 = vmul.f32 1.442695, %v720_v44  ;;  %v764_v56 = vmul.f32 1.442695, %v721_v45  ;;  %v883_v12 = vrot.slane %v2105_v51, 2 }
 0x13f   :  { %v843_v62 = vsel %vm565_vm6, %v2109_v23, 0.0  ;;  %v583_v63 = vmax.f32 %v581_v38, %v582_v54  ;;  %v689_v3 = vmax.f32 %v687_v39, %v688_v55  ;;  %v584_v13 = vsel %vm565_vm6, %v2097_v33, -inf }
 0x140   :  { %v844_v4 = vadd.f32 %v843_v62, %v842_v36  ;;  %1645 = vpow2.f32 %v762_v47  ;;  %v456_v7 = vpop.xlane.xlu1 %455  ;;  %v387_v8 = vpop.xlane.xlu2 %386  ;;  %v651_v16 = vmax.f32 %v649_v60, %v650_v1  ;;  %v2130_v18 = vadd.f32 %v809_v61, %v808_v37  ;;  %v2176_v61 = vld [vmem:[%s2567_s3 + $0x3] ss:$0 sm:$0xff] }
 0x141   :  { %1647 = vpow2.f32 %v764_v56  ;;  %v712_v58 = vsub.f32 %v2002_v43, %v583_v63  ;;  %v713_v2 = vsub.f32 %v2014_v50, %v583_v63  ;;  %v690_v10 = vrot.slane %v689_v3, 1  ;;  %v435_v34 = vpop.xlane.xlu0 %434 }
 0x142   :  { %v845_v43 = vrot.slane %v844_v4, 4  ;;  %v652_v26 = vrot.slane %v651_v16, 2  ;;  %v656_v50 = vsel %vm565_vm6, %v2120_v6, -inf  ;;  %v2137_v27 = vsel %vm506_vm8, %v387_v8, -1e+09 }
 0x143   :  { %v746_v21 = vmul.f32 1.442695, %v712_v58  ;;  %v748_v22 = vmul.f32 1.442695, %v713_v2  ;;  %v691_v25 = vmax.f32 %v689_v3, %v690_v10  ;;  %v2144_v24 = vsel %vm513_vm7, %v408_v42, -1e+09 }
 0x144   :  { %v585_v32 = vsel %vm565_vm6, %v2137_v27, -inf  ;;  %v653_v37 = vmax.f32 %v651_v16, %v652_v26  ;;  %v2153_v40 = vsel %vm529_vm9, %v456_v7, -1e+09  ;;  %v2164_v54 = vsel %vm522_vm10, %v435_v34, -1e+09 }
 0x145   :  { %v736_v28 = vsub.f32 %v1999_v41, %v691_v25  ;;  %v737_v30 = vsub.f32 %v2032_v57, %v691_v25  ;;  %1649 = vpow2.f32 %v746_v21  ;;  %v586_v41 = vmax.f32 %v584_v13, %v585_v32 }
 0x146   :  { %v2148_v35 = vpop.eup %1645  ;;  %1651 = vpow2.f32 %v748_v22  ;;  %v654_v45 = vrot.slane %v653_v37, 1  ;;  %v657_v47 = vsel %vm565_vm6, %v2164_v54, -inf  ;;  %v811_v3 = vrot.slane %v2130_v18, 2 }
 0x147   :  { %v2155_v57 = vpop.eup %1647  ;;  %v851_v38 = vsel %vm565_vm6, %v2148_v35, 0.0  ;;  %v794_v39 = vmul.f32 1.442695, %v736_v28  ;;  %v796_v42 = vmul.f32 1.442695, %v737_v30  ;;  %v587_v46 = vrot.slane %v586_v41, 4 }
 0x148   :  { %v852_v44 = vsel %vm565_vm6, %v2155_v57, 0.0  ;;  %v411_v55 = vpop.xlane.xlu1 %410  ;;  %v459_v60 = vpop.xlane.xlu2 %458  ;;  %v655_v52 = vmax.f32 %v653_v37, %v654_v45  ;;  %v658_v63 = vmax.f32 %v656_v50, %v657_v47  ;;  %v2179_v1 = vadd.f32 %v845_v43, %v844_v4 }
 0x149   :  { %v853_v36 = vadd.f32 %v852_v44, %v851_v38  ;;  %1653 = vpow2.f32 %v794_v39  ;;  %v2171_v56 = vsel %vm514_vm11, %v411_v55, -1e+09  ;;  %v588_v62 = vmax.f32 %v586_v41, %v587_v46 }
 0x14a   :  { %1655 = vpow2.f32 %v796_v42  ;;  %v620_v7 = vsel %vm565_vm6, %v2144_v24, -inf  ;;  %v621_v14 = vsel %vm565_vm6, %v2171_v56, -inf  ;;  %v728_v58 = vsub.f32 %v2067_v17, %v655_v52 }
 0x14b   :  { %v2185_v8 = vpop.eup %1649  ;;  %v729_v2 = vsub.f32 %v2083_v31, %v655_v52  ;;  %v589_v10 = vrot.slane %v588_v62, 2  ;;  %v2192_v13 = vsel %vm530_vm12, %v459_v60, -1e+09  ;;  %v692_v16 = vsel %vm565_vm6, %v2153_v40, -inf }
 0x14c   :  { %v2194_v4 = vpop.eup %1651  ;;  %v659_v21 = vrot.slane %v658_v63, 4  ;;  %v622_v22 = vmax.f32 %v620_v7, %v621_v14  ;;  %vm507_vm13 = vcmp.lt.s32.totalorder %v1903_v20, %v2176_v61  ;;  %v854_v25 = vrot.slane %v853_v36, 4 }
 0x14d   :  { %v778_v17 = vmul.f32 1.442695, %v728_v58  ;;  %v780_v43 = vmul.f32 1.442695, %v729_v2  ;;  %v590_v31 = vmax.f32 %v588_v62, %v589_v10  ;;  %v815_v19 = vsel %vm565_vm6, %v2185_v8, 0.0  ;;  %v390_v62 = vpop.xlane.xlu0 %389 }
 0x14e   :  { %v660_v50 = vmax.f32 %v658_v63, %v659_v21  ;;  %v623_v28 = vrot.slane %v622_v22, 4  ;;  %v693_v30 = vsel %vm565_vm6, %v2192_v13, -inf  ;;  %v816_v34 = vsel %vm565_vm6, %v2194_v4, 0.0 }
 0x14f   :  { %v2200_v26 = vpop.eup %1653  ;;  %1657 = vpow2.f32 %v778_v17  ;;  %v591_v41 = vrot.slane %v590_v31, 1  ;;  %v847_v44 = vrot.slane %v2179_v1, 2  ;;  %v2215_v45 = vadd.f32 %v854_v25, %v853_v36 }
 0x150   :  { %v2206_v32 = vpop.eup %1655  ;;  %v923_v37 = vsel %vm565_vm6, %v2200_v26, 0.0  ;;  %1659 = vpow2.f32 %v780_v43  ;;  %v661_v39 = vrot.slane %v660_v50, 2  ;;  %v624_v42 = vmax.f32 %v622_v22, %v623_v28 }
 0x151   :  { %v924_v38 = vsel %vm565_vm6, %v2206_v32, 0.0  ;;  %v592_v46 = vmax.f32 %v590_v31, %v591_v41  ;;  %v694_v55 = vmax.f32 %v692_v16, %v693_v30  ;;  %v817_v47 = vadd.f32 %v816_v34, %v815_v19 }
 0x152   :  { %v662_v60 = vmax.f32 %v660_v50, %v661_v39  ;;  %v625_v52 = vrot.slane %v624_v42, 2  ;;  %v884_v63 = vadd.f32 %v883_v12, %v2105_v51  ;;  %v925_v7 = vadd.f32 %v924_v38, %v923_v37  ;;  %v2236_v50 = vld [vmem:[%s2567_s3 + $0xb] ss:$0 sm:$0xff] }
 0x153   :  { %v714_v14 = vsub.f32 %v2097_v33, %v592_v46  ;;  %v715_v58 = vsub.f32 %v2137_v27, %v592_v46  ;;  %v2225_v36 = vsel %vm507_vm13, %v390_v62, -1e+09  ;;  %v695_v16 = vrot.slane %v694_v55, 4 }
 0x154   :  { %v663_v2 = vrot.slane %v662_v60, 1  ;;  %v626_v10 = vmax.f32 %v624_v42, %v625_v52  ;;  %v885_v21 = vrot.slane %v884_v63, 1  ;;  %v856_v25 = vrot.slane %v2215_v45, 2  ;;  %v414_v52 = vpop.xlane.xlu2 %413 }
 0x155   :  { %v2227_v22 = vpop.eup %1657  ;;  %v750_v17 = vmul.f32 1.442695, %v714_v14  ;;  %v752_v51 = vmul.f32 1.442695, %v715_v58  ;;  %v812_v12 = vadd.f32 %v811_v3, %v2130_v18  ;;  %v818_v27 = vrot.slane %v817_v47, 4  ;;  %v438_v18 = vpop.xlane.xlu1 %437 }
 0x156   :  { %v2231_v33 = vpop.eup %1659  ;;  %v664_v43 = vmax.f32 %v662_v60, %v663_v2  ;;  %v627_v31 = vrot.slane %v626_v10, 1  ;;  %v696_v19 = vmax.f32 %v694_v55, %v695_v16  ;;  %v887_v28 = vsel %vm565_vm6, %v2227_v22, 0.0 }
 0x157   :  { %v888_v30 = vsel %vm565_vm6, %v2231_v33, 0.0  ;;  %1661 = vpow2.f32 %v750_v17  ;;  %v886_v34 = vadd.f32 %v885_v21, %v884_v63  ;;  %v926_v3 = vrot.slane %v925_v7, 4 }
 0x158   :  { %1663 = vpow2.f32 %v752_v51  ;;  %v730_v37 = vsub.f32 %v2120_v6, %v664_v43  ;;  %v731_v41 = vsub.f32 %v2164_v54, %v664_v43  ;;  %v628_v38 = vmax.f32 %v626_v10, %v627_v31  ;;  %v2251_v6 = vld [vmem:[%s2567_s3 + $0x7] ss:$0 sm:$0xff] }
 0x159   :  { %v697_v39 = vrot.slane %v696_v19, 2  ;;  %1665 = vrcp.f32 %v886_v34  ;;  %v813_v42 = vrot.slane %v812_v12, 1  ;;  %v889_v46 = vadd.f32 %v888_v30, %v887_v28 }
 0x15a   :  { %v782_v55 = vmul.f32 1.442695, %v730_v37  ;;  %v784_v60 = vmul.f32 1.442695, %v731_v41  ;;  %vm523_vm14 = vcmp.lt.s32.totalorder %v1903_v20, %v2236_v50  ;;  %v722_v62 = vsub.f32 %v2144_v24, %v628_v38 }
 0x15b   :  { %v723_v63 = vsub.f32 %v2171_v56, %v628_v38  ;;  %v698_v14 = vmax.f32 %v696_v19, %v697_v39  ;;  %v814_v58 = vadd.f32 %v813_v42, %v812_v12  ;;  %v2253_v54 = vadd.f32 %v818_v27, %v817_v47  ;;  %v462_v12 = vpop.xlane.xlu0 %461  ;;  %v2281_v19 = vld [vmem:[%s2567_s3 + $0xf] ss:$0 sm:$0xff]  ;;  %s1781_s3 = smov [#allocation5]  }
 0x15c   :  { %v2255_v2 = vadd.f32 %v926_v3, %v925_v7  ;;  %1667 = vpow2.f32 %v782_v55  ;;  %v2259_v10 = vsel %vm565_vm6, %v2225_v36, -inf  ;;  %v766_v24 = vmul.f32 1.442695, %v722_v62  ;;  %s1411_s28 = sshll.u32 %s1781_s3, 4  ;;  %s1412_s28 = int_to_ptr.vmem [resolvable:$true] %s1411_s28 }
 0x15d   :  { %v2261_v16 = vpop.eup %1661  ;;  %1669 = vpow2.f32 %v784_v60  ;;  %v768_v56 = vmul.f32 1.442695, %v723_v63  ;;  %v699_v21 = vrot.slane %v698_v14, 1  ;;  %v890_v51 = vrot.slane %v889_v46, 4  ;;  %v393_v38 = vpop.xlane.xlu1 %392 }
 0x15e   :  { %v2263_v17 = vpop.eup %1663  ;;  %v824_v47 = vsel %vm565_vm6, %v2261_v16, 0.0  ;;  %1671 = vrcp.f32 %v814_v58  ;;  %v2270_v7 = vsel %vm523_vm14, %v438_v18, -1e+09  ;;  %vm515_vm15 = vcmp.lt.s32.totalorder %v1903_v20, %v2251_v6 }
 0x15f   :  { %v2272_v27 = vpop.eup %1665  ;;  %v825_v43 = vsel %vm565_vm6, %v2263_v17, 0.0  ;;  %1673 = vpow2.f32 %v766_v24  ;;  %v700_v31 = vmax.f32 %v698_v14, %v699_v21  ;;  %v820_v28 = vrot.slane %v2253_v54, 2 }
 0x160   :  { %v928_v30 = vrot.slane %v2255_v2, 2  ;;  %1675 = vpow2.f32 %v768_v56  ;;  %v982_v34 = vmul.f32 %v2272_v27, %v2023_v53  ;;  %v826_v18 = vadd.f32 %v825_v43, %v824_v47 }
 0x161   :  { %v738_v3 = vsub.f32 %v2153_v40, %v700_v31  ;;  %v739_v37 = vsub.f32 %v2192_v13, %v700_v31  ;;  %v920_v41 = vadd.f32 %v919_v11, %v2103_v49  ;;  %v2294_v42 = vadd.f32 %v890_v51, %v889_v46 }
 0x162   :  { %v2292_v39 = vpop.eup %1667  ;;  %1112 = vperm.xlu1 %1547, %v982_v34   ;;  %v665_v55 = vsel %vm565_vm6, %v2270_v7, -inf  ;;  %v2298_v60 = vsel %vm515_vm15, %v414_v52, -1e+09  ;;  %v848_v53 = vadd.f32 %v847_v44, %v2179_v1  ;;  %vm531_vm1 = vcmp.lt.s32.totalorder %v1903_v20, %v2281_v19  ;;  %v441_v1 = vpop.xlane.xlu2 %440 }
 0x163   :  { %v2303_v40 = vpop.eup %1669  ;;  %v896_v49 = vsel %vm565_vm6, %v2292_v39, 0.0  ;;  %v798_v11 = vmul.f32 1.442695, %v738_v3  ;;  %v800_v13 = vmul.f32 1.442695, %v739_v37  ;;  %v921_v52 = vrot.slane %v920_v41, 1 }
 0x164   :  { %v1672_v46 = vpop.eup %1671  ;;  %v897_v62 = vsel %vm565_vm6, %v2303_v40, 0.0  ;;  %v849_v63 = vrot.slane %v848_v53, 1  ;;  %vm524_vm2 = vcmp.lt.s32.totalorder %v1915_v29, %v2236_v50  ;;  %v827_v14 = vrot.slane %v826_v18, 4 }
 0x165   :  { %v2313_v44 = vpop.eup %1673  ;;  %v898_v58 = vadd.f32 %v897_v62, %v896_v49  ;;  %v966_v24 = vmul.f32 %v1672_v46, %v2052_v9  ;;  %v967_v56 = vmul.f32 %v1672_v46, %v2061_v15  ;;  %1677 = vpow2.f32 %v798_v11 }
 0x166   :  { %v2317_v21 = vpop.eup %1675  ;;  %v860_v20 = vsel %vm565_vm6, %v2313_v44, 0.0  ;;  %v2321_v51 = vsel %vm531_vm1, %v462_v12, -1e+09  ;;  %v922_v47 = vadd.f32 %v921_v52, %v920_v41  ;;  %1679 = vpow2.f32 %v800_v13  ;;  %v417_v12 = vpop.xlane.xlu0 %416 }
 0x167   :  { %v861_v43 = vsel %vm565_vm6, %v2317_v21, 0.0  ;;  %1032 = vperm.xlu2 %1545, %v966_v24   ;;  %1037 = vperm.xlu0 %1546, %v967_v56   ;;  %v850_v31 = vadd.f32 %v849_v63, %v848_v53  ;;  %v2328_v9 = vsel %vm524_vm2, %v441_v1, -1e+09  ;;  %v899_v15 = vrot.slane %v898_v58, 4 }
 0x168   :  { %1681 = vrcp.f32 %v922_v47  ;;  %v666_v34 = vsel %vm565_vm6, %v2328_v9, -inf  ;;  %vm508_vm3 = vcmp.lt.s32.totalorder %v1915_v29, %v2176_v61  ;;  %v2334_v3 = vadd.f32 %v827_v14, %v826_v18 }
 0x169   :  { %1683 = vrcp.f32 %v850_v31  ;;  %v667_v37 = vmax.f32 %v665_v55, %v666_v34  ;;  %v2336_v41 = vsel %vm508_vm3, %v393_v38, -1e+09  ;;  %v892_v53 = vrot.slane %v2294_v42, 2  ;;  %v465_v38 = vpop.xlane.xlu1 %464 }
 0x16a   :  { %v2339_v50 = vadd.f32 %v861_v43, %v860_v20  ;;  %v594_v49 = vsel %vm565_vm6, %v2336_v41, -inf  ;;  %vm516_vm4 = vcmp.lt.s32.totalorder %v1915_v29, %v2251_v6  ;;  %v629_v61 = vsel %vm565_vm6, %v2298_v60, -inf }
 0x16b   :  { %v668_v11 = vrot.slane %v667_v37, 4  ;;  %v595_v18 = vmax.f32 %v2259_v10, %v594_v49  ;;  %v2348_v13 = vsel %vm516_vm4, %v417_v12, -1e+09  ;;  %v2350_v55 = vpop.eup %1677  ;;  %v2352_v46 = vadd.f32 %v899_v15, %v898_v58 }
 0x16c   :  { %v701_v62 = vsel %vm565_vm6, %v2321_v51, -inf  ;;  %v630_v52 = vsel %vm565_vm6, %v2348_v13, -inf  ;;  %vm532_vm5 = vcmp.lt.s32.totalorder %v1915_v29, %v2281_v19  ;;  %v2360_v6 = vpop.eup %1679  ;;  %v829_v10 = vrot.slane %v2334_v3, 2 }
 0x16d   :  { %v669_v63 = vmax.f32 %v667_v37, %v668_v11  ;;  %v596_v1 = vrot.slane %v595_v18, 4  ;;  %v631_v14 = vmax.f32 %v629_v61, %v630_v52  ;;  %v863_v58 = vrot.slane %v2339_v50, 4 }
 0x16e   :  { %v1682_v24 = vpop.eup %1681  ;;  %v983_v56 = vmul.f32 %v2272_v27, %v2046_v5  ;;  %v2366_v20 = vsel %vm532_vm5, %v465_v38, -1e+09  ;;  %v821_v47 = vadd.f32 %v820_v28, %v2253_v54  ;;  %v901_v34 = vrot.slane %v2352_v46, 2 }
 0x16f   :  { %v1684_v29 = vpop.eup %1683  ;;  %v991_v19 = vmul.f32 %v1682_v24, %v2040_v0  ;;  %v670_v43 = vrot.slane %v669_v63, 2  ;;  %v597_v31 = vmax.f32 %v595_v18, %v596_v1  ;;  %v632_v15 = vrot.slane %v631_v14, 4 }
 0x170   :  { %v932_v12 = vsel %vm565_vm6, %v2350_v55, 0.0  ;;  %v975_v37 = vmul.f32 %v1684_v29, %v2109_v23  ;;  %v974_v5 = vmul.f32 %v1684_v29, %v2101_v48  ;;  %v702_v54 = vsel %vm565_vm6, %v2366_v20, -inf }
 0x171   :  { %1157 = vperm.xlu1 %1547, %v991_v19   ;;  %v671_v27 = vmax.f32 %v669_v63, %v670_v43  ;;  %v598_v49 = vrot.slane %v597_v31, 2  ;;  %v633_v61 = vmax.f32 %v631_v14, %v632_v15  ;;  %v933_v0 = vsel %vm565_vm6, %v2360_v6, 0.0 }
 0x172   :  { %1077 = vperm.xlu2 %1545, %v975_v37   ;;  %1072 = vperm.xlu0 %1546, %v974_v5   ;;  %v703_v28 = vmax.f32 %v701_v62, %v702_v54  ;;  %v822_v11 = vrot.slane %v821_v47, 1  ;;  %v857_v23 = vadd.f32 %v856_v25, %v2215_v45  ;;  %v893_v52 = vadd.f32 %v892_v53, %v2294_v42 }
 0x173   :  { %v672_v18 = vrot.slane %v671_v27, 1  ;;  %v599_v48 = vmax.f32 %v597_v31, %v598_v49  ;;  %v634_v38 = vrot.slane %v633_v61, 2  ;;  %v990_v63 = vmul.f32 %v1682_v24, %v2034_v59 }
 0x174   :  { %v704_v1 = vrot.slane %v703_v28, 4  ;;  %v823_v14 = vadd.f32 %v822_v11, %v821_v47  ;;  %v858_v29 = vrot.slane %v857_v23, 1  ;;  %v894_v37 = vrot.slane %v893_v52, 1 }
 0x175   :  { %v673_v19 = vmax.f32 %v671_v27, %v672_v18  ;;  %v600_v43 = vrot.slane %v599_v48, 1  ;;  %v635_v15 = vmax.f32 %v633_v61, %v634_v38  ;;  %v929_v45 = vadd.f32 %v928_v30, %v2255_v2 }
 0x176   :  { %v705_v62 = vmax.f32 %v703_v28, %v704_v1  ;;  %1685 = vrcp.f32 %v823_v14  ;;  %v859_v5 = vadd.f32 %v858_v29, %v857_v23  ;;  %v895_v47 = vadd.f32 %v894_v37, %v893_v52 }
 0x177   :  { %v732_v25 = vsub.f32 %v2270_v7, %v673_v19  ;;  %v733_v42 = vsub.f32 %v2328_v9, %v673_v19  ;;  %v601_v53 = vmax.f32 %v599_v48, %v600_v43  ;;  %v636_v59 = vrot.slane %v635_v15, 1 }
 0x178   :  { %v706_v24 = vrot.slane %v705_v62, 2  ;;  %1687 = vrcp.f32 %v859_v5  ;;  %v930_v31 = vrot.slane %v929_v45, 1  ;;  %v902_v11 = vadd.f32 %v901_v34, %v2352_v46 }
 0x179   :  { %v786_v27 = vmul.f32 1.442695, %v732_v25  ;;  %v788_v49 = vmul.f32 1.442695, %v733_v42  ;;  %v716_v61 = vsub.f32 %v2225_v36, %v601_v53  ;;  %v717_v54 = vsub.f32 %v2336_v41, %v601_v53 }
 0x17a   :  { %v637_v28 = vmax.f32 %v635_v15, %v636_v59  ;;  %1152 = vperm.xlu2 %1545, %v990_v63   ;;  %1117 = vperm.xlu0 %1546, %v983_v56   ;;  %v707_v2 = vmax.f32 %v705_v62, %v706_v24  ;;  %1689 = vrcp.f32 %v895_v47  ;;  %v931_v7 = vadd.f32 %v930_v31, %v929_v45 }
 0x17b   :  { %1691 = vpow2.f32 %v786_v27  ;;  %v754_v30 = vmul.f32 1.442695, %v716_v61  ;;  %v756_v9 = vmul.f32 1.442695, %v717_v54  ;;  %v934_v38 = vadd.f32 %v933_v0, %v932_v12 }
 0x17c   :  { %v1686_v23 = vpop.eup %1685  ;;  %1693 = vpow2.f32 %v788_v49  ;;  %v724_v18 = vsub.f32 %v2298_v60, %v637_v28  ;;  %v725_v48 = vsub.f32 %v2348_v13, %v637_v28  ;;  %v708_v36 = vrot.slane %v707_v2, 1 }
 0x17d   :  { %1695 = vpow2.f32 %v754_v30  ;;  %v968_v41 = vmul.f32 %v1686_v23, %v2185_v8  ;;  %v903_v56 = vrot.slane %v902_v11, 1  ;;  %v864_v46 = vadd.f32 %v863_v58, %v2339_v50 }
 0x17e   :  { %v1688_v52 = vpop.eup %1687  ;;  %1697 = vpow2.f32 %v756_v9  ;;  %v770_v63 = vmul.f32 1.442695, %v724_v18  ;;  %v772_v1 = vmul.f32 1.442695, %v725_v48  ;;  %v709_v14 = vmax.f32 %v707_v2, %v708_v36 }
 0x17f   :  { %1042 = vperm.xlu1 %1547, %v968_v41   ;;  %1699 = vrcp.f32 %v931_v7  ;;  %v969_v13 = vmul.f32 %v1686_v23, %v2194_v4  ;;  %v977_v34 = vmul.f32 %v1688_v52, %v2155_v57  ;;  %v830_v8 = vadd.f32 %v829_v10, %v2334_v3 }
 0x180   :  { %v1690_v60 = vpop.eup %1689  ;;  %1701 = vpow2.f32 %v770_v63  ;;  %v904_v0 = vadd.f32 %v903_v56, %v902_v11  ;;  %v935_v19 = vrot.slane %v934_v38, 4  ;;  %v740_v58 = vsub.f32 %v2321_v51, %v709_v14 }
 0x181   :  { %v2405_v12 = vpop.eup %1691  ;;  %1703 = vpow2.f32 %v772_v1  ;;  %v865_v57 = vrot.slane %v864_v46, 2  ;;  %v741_v10 = vsub.f32 %v2366_v20, %v709_v14  ;;  %v831_v37 = vrot.slane %v830_v8, 1 }
 0x182   :  { %v2407_v29 = vpop.eup %1693  ;;  %v905_v50 = vsel %vm565_vm6, %v2405_v12, 0.0  ;;  %1047 = vperm.xlu2 %1545, %v969_v13   ;;  %1087 = vperm.xlu0 %1546, %v977_v34   ;;  %v976_v45 = vmul.f32 %v1688_v52, %v2148_v35  ;;  %1705 = vrcp.f32 %v904_v0  ;;  %v936_v42 = vadd.f32 %v935_v19, %v934_v38 }
 0x183   :  { %v2412_v4 = vpop.eup %1695  ;;  %v906_v3 = vsel %vm565_vm6, %v2407_v29, 0.0  ;;  %v802_v59 = vmul.f32 1.442695, %v740_v58  ;;  %v804_v47 = vmul.f32 1.442695, %v741_v10  ;;  %v984_v31 = vmul.f32 %v1690_v60, %v2227_v22 }
 0x184   :  { %v2417_v43 = vpop.eup %1697  ;;  %v907_v15 = vadd.f32 %v906_v3, %v905_v50  ;;  %v833_v5 = vsel %vm565_vm6, %v2412_v4, 0.0  ;;  %v866_v27 = vadd.f32 %v865_v57, %v864_v46  ;;  %v832_v54 = vadd.f32 %v831_v37, %v830_v8 }
 0x185   :  { %v1700_v62 = vpop.eup %1699  ;;  %v834_v51 = vsel %vm565_vm6, %v2417_v43, 0.0  ;;  %1707 = vpow2.f32 %v802_v59  ;;  %v937_v9 = vrot.slane %v936_v42, 2  ;;  %v985_v48 = vmul.f32 %v1690_v60, %v2231_v33 }
 0x186   :  { %v2424_v25 = vpop.eup %1701  ;;  %v908_v53 = vrot.slane %v907_v15, 4  ;;  %v835_v49 = vadd.f32 %v834_v51, %v833_v5  ;;  %v992_v61 = vmul.f32 %v1700_v62, %v2200_v26  ;;  %1709 = vpow2.f32 %v804_v47 }
 0x187   :  { %v2426_v20 = vpop.eup %1703  ;;  %v869_v24 = vsel %vm565_vm6, %v2424_v25, 0.0  ;;  %1082 = vperm.xlu1 %1547, %v976_v45   ;;  %1711 = vrcp.f32 %v832_v54  ;;  %v867_v22 = vrot.slane %v866_v27, 1  ;;  %v993_v56 = vmul.f32 %v1700_v62, %v2206_v32 }
 0x188   :  { %v870_v35 = vsel %vm565_vm6, %v2426_v20, 0.0  ;;  %v909_v28 = vadd.f32 %v908_v53, %v907_v15  ;;  %v1706_v7 = vpop.eup %1705  ;;  %v836_v11 = vrot.slane %v835_v49, 4  ;;  %v938_v63 = vadd.f32 %v937_v9, %v936_v42  ;;  %v59_v9 = vld [vmem:[#allocation2 + $0x60] sm:$0xff]  }
 0x189   :  { %v871_v2 = vadd.f32 %v870_v35, %v869_v24  ;;  %v986_v36 = vmul.f32 %v1706_v7, %v2292_v39  ;;  %v868_v52 = vadd.f32 %v867_v22, %v866_v27  ;;  %v1022_v22 = vunpack.c.l.bf16 %v59_v9 }
 0x18a   :  { %1122 = vperm.xlu2 %1545, %v984_v31   ;;  %1162 = vperm.xlu0 %1546, %v992_v61   ;;  %v910_v23 = vrot.slane %v909_v28, 2  ;;  %v837_v41 = vadd.f32 %v836_v11, %v835_v49  ;;  %v939_v60 = vrot.slane %v938_v63, 1  ;;  %vm1384_vm7 = vcmask 1042434  }
 0x18b   :  { %v872_v30 = vrot.slane %v871_v2, 4  ;;  %v2436_v38 = vpop.eup %1707  ;;  %1713 = vrcp.f32 %v868_v52  ;;  %vm1386_vm8 = vcmask 1043459   ;;  %vm1388_vm9 = vcmask 1044484  }
 0x18c   :  { %v2439_v1 = vpop.eup %1709  ;;  %v911_v46 = vadd.f32 %v910_v23, %v909_v28  ;;  %v838_v33 = vrot.slane %v837_v41, 2  ;;  %v941_v39 = vsel %vm565_vm6, %v2436_v38, 0.0  ;;  %v940_v57 = vadd.f32 %v939_v60, %v938_v63 }
 0x18d   :  { %v873_v18 = vadd.f32 %v872_v30, %v871_v2  ;;  %v1712_v13 = vpop.eup %1711  ;;  %v942_v8 = vsel %vm565_vm6, %v2439_v1, 0.0  ;;  %vm1382_vm6 = vcmask 1041409   ;;  %vm1390_vm10 = vcmask 1045509  }
 0x18e   :  { %v971_v32 = vmul.f32 %v1712_v13, %v2263_v17  ;;  %v912_v19 = vrot.slane %v911_v46, 1  ;;  %v943_v50 = vadd.f32 %v942_v8, %v941_v39  ;;  %v970_v58 = vmul.f32 %v1712_v13, %v2261_v16 }
 0x18f   :  { %v874_v26 = vrot.slane %v873_v18, 2  ;;  %1127 = vperm.xlu1 %1547, %v985_v48   ;;  %v839_v3 = vadd.f32 %v838_v33, %v837_v41  ;;  %vm1392_vm11 = vcmask 1046534   ;;  %vm1394_vm12 = vcmask 1047559  }
 0x190   :  { %v913_v10 = vadd.f32 %v912_v19, %v911_v46  ;;  %v944_v37 = vrot.slane %v943_v50, 4  ;;  %v2476_v19 = vld [vmem:[#allocation2 + $0x1c] sm:$0xff]  }
 0x191   :  { %v875_v14 = vadd.f32 %v874_v26, %v873_v18  ;;  %v1714_v15 = vpop.eup %1713  ;;  %v840_v62 = vrot.slane %v839_v3, 1 }
 0x192   :  { %1167 = vperm.xlu2 %1545, %v993_v56   ;;  %1132 = vperm.xlu0 %1546, %v986_v36   ;;  %v979_v51 = vmul.f32 %v1714_v15, %v2317_v21  ;;  %v945_v45 = vadd.f32 %v944_v37, %v943_v50  ;;  %v978_v42 = vmul.f32 %v1714_v15, %v2313_v44  ;;  %v51_v15 = vld [vmem:[#allocation2 + $0x40] sm:$0xff]  }
 0x193   :  { %v876_v34 = vrot.slane %v875_v14, 1  ;;  %v841_v16 = vadd.f32 %v840_v62, %v839_v3  ;;  %v987_v21 = vmul.f32 %v1706_v7, %v2303_v40  ;;  %v37_v3 = vld [vmem:[#allocation2 + $0x8] sm:$0xf] }
 0x194   :  { %v946_v24 = vrot.slane %v945_v45, 2 }
 0x195   :  { %v877_v0 = vadd.f32 %v876_v34, %v875_v14 }
 0x197   :  { %1057 = vperm.xlu1 %1547, %v971_v32   ;;  %1715 = vrcp.f32 %v877_v0 }
 0x198   :  { %1717 = vrcp.f32 %v940_v57  ;;  %v1006_v57 = vunpack.c.h.bf16 %v2476_v19 }
 0x199   :  { %1719 = vrcp.f32 %v913_v10 }
 0x19a   :  { %1052 = vperm.xlu2 %1545, %v970_v58   ;;  %1721 = vrcp.f32 %v841_v16  ;;  %v44_v58 = vld [vmem:[#allocation2 + $0x24] sm:$0xff]  }
 0x19b   :  { %v1007_v62 = vunpack.c.l.bf16 %v44_v58 }
 0x19d   :  { %v1716_v5 = vpop.eup %1715 }
 0x19e   :  { %v980_v17 = vmul.f32 %v1716_v5, %v2424_v25  ;;  %v1718_v53 = vpop.eup %1717  ;;  %v947_v25 = vadd.f32 %v946_v24, %v945_v45  ;;  %v981_v40 = vmul.f32 %v1716_v5, %v2426_v20  ;;  %v38_v5 = vld [vmem:[#allocation2 + $0xc] sm:$0xff]   ;;  %v1000_v45 = vunpack.c.l.bf16 %v37_v3 }
 0x19f   :  { %1097 = vperm.xlu1 %1547, %v979_v51   ;;  %v1720_v59 = vpop.eup %1719  ;;  %v994_v47 = vmul.f32 %v1718_v53, %v2350_v55  ;;  %v995_v35 = vmul.f32 %v1718_v53, %v2360_v6 }
 0x1a0   :  { %1102 = vperm.xlu0 %1546, %v980_v17   ;;  %v989_v31 = vmul.f32 %v1720_v59, %v2407_v29  ;;  %v1722_v27 = vpop.eup %1721  ;;  %v948_v49 = vrot.slane %v947_v25, 1  ;;  %v988_v55 = vmul.f32 %v1720_v59, %v2405_v12  ;;  %v1023_v12 = vunpack.c.h.bf16 %v59_v9 }
 0x1a1   :  { %v973_v44 = vmul.f32 %v1722_v27, %v2417_v43  ;;  %v972_v61 = vmul.f32 %v1722_v27, %v2412_v4  ;;  %v1015_v17 = vunpack.c.h.bf16 %v51_v15  ;;  %v1001_v59 = vunpack.c.l.bf16 %v38_v5 }
 0x1a2   :  { %1092 = vperm.xlu2 %1545, %v978_v42   ;;  %v949_v54 = vadd.f32 %v948_v49, %v947_v25  ;;  %v1014_v42 = vunpack.c.l.bf16 %v51_v15 }
 0x1a4   :  { %1723 = vrcp.f32 %v949_v54 }
 0x1a7   :  { %1172 = vperm.xlu1 %1547, %v994_v47  }
 0x1a8   :  { %1147 = vperm.xlu0 %1546, %v989_v31  }
 0x1aa   :  { %1137 = vperm.xlu2 %1545, %v987_v21   ;;  %v1724_v29 = vpop.eup %1723  ;;  %v53_v21 = vld [vmem:[#allocation2 + $0x48] sm:$0xff]  }
 0x1ab   :  { %v997_v28 = vmul.f32 %v1724_v29, %v2439_v1  ;;  %v996_v43 = vmul.f32 %v1724_v29, %v2436_v38  ;;  %v35_v1 = vld [vmem:[#allocation2] sm:$0xff]  }
 0x1ac   :  { %v999_v14 = vunpack.c.h.bf16 %v35_v1  ;;  %v998_v13 = vunpack.c.l.bf16 %v35_v1  ;;  %v48_v1 = vld [vmem:[#allocation2 + $0x34] sm:$0xff]  }
 0x1af   :  { %1067 = vperm.xlu1 %1547, %v973_v44   ;;  %v2482_v44 = vld [vmem:[#allocation2 + $0x14] sm:$0xff]  }
 0x1b0   :  { %1177 = vperm.xlu0 %1546, %v995_v35  }
 0x1b2   :  { %1062 = vperm.xlu2 %1545, %v972_v61  }
 0x1b7   :  { %1142 = vperm.xlu1 %1547, %v988_v55  }
 0x1ba   :  { %1107 = vperm.xlu2 %1545, %v981_v40   ;;  %v1016_v40 = vunpack.c.l.bf16 %v53_v21 }
 0x1bf   :  { %1187 = vperm.xlu1 %1547, %v997_v28   ;;  %v46_v28 = vld [vmem:[#allocation2 + $0x2c] sm:$0xff]  }
 0x1c1   :  { %v1033_v6 = vpop.permute.xlu2 %1032 }
 0x1c2   :  { %1182 = vperm.xlu2 %1545, %v996_v43   ;;  %v1190_v39 = vmul.f32 %v1033_v6, %v998_v13 }
 0x1c4   :  { %v1222_v0 = vsel %vm163_vm0, %v1190_v39, 0.0  ;;  %v61_v39 = vld [vmem:[#allocation2 + $0x68] sm:$0xf] }
 0x1cc   :  { %v1078_v2 = vpop.permute.xlu2 %1077 }
 0x1cd   :  { %v1199_v24 = vmul.f32 %v1078_v2, %v1007_v62  ;;  %v2486_v2 = vld [vmem:[#allocation2 + $0x6c] sm:$0xff]   ;;  %v1011_v62 = vunpack.c.l.bf16 %v48_v1 }
 0x1cf   :  { %v1259_v54 = vsel %vm163_vm0, %v1199_v24, 0.0 }
 0x1d4   :  { %v1153_v4 = vpop.permute.xlu2 %1152  ;;  %v1113_v7 = vpop.permute.xlu1 %1112 }
 0x1d5   :  { %v1214_v23 = vmul.f32 %v1153_v4, %v1022_v22  ;;  %v1206_v27 = vmul.f32 %v1113_v7, %v1014_v42  ;;  %v1008_v7 = vunpack.c.h.bf16 %v44_v58  ;;  %v1024_v42 = vunpack.c.l.bf16 %v61_v39 }
 0x1d7   :  { %v1330_v26 = vsel %vm163_vm0, %v1214_v23, 0.0  ;;  %v1294_v9 = vsel %vm163_vm0, %v1206_v27, 0.0 }
 0x1d9   :  { %v1038_v30 = vpop.permute.xlu0 %1037 }
 0x1da   :  { %v1191_v33 = vmul.f32 %v1038_v30, %v999_v14  ;;  %v1003_v30 = vunpack.c.l.bf16 %v2482_v44 }
 0x1dc   :  { %v1048_v11 = vpop.permute.xlu2 %1047  ;;  %v1223_v8 = vsel %vm163_vm0, %v1191_v33, 0.0 }
 0x1dd   :  { %v1224_v50 = vadd.f32 %v1223_v8, %v1222_v0  ;;  %v1193_v35 = vmul.f32 %v1048_v11, %v1001_v59  ;;  %v1017_v11 = vunpack.c.h.bf16 %v53_v21  ;;  %v1010_v0 = vunpack.c.h.bf16 %v46_v28 }
 0x1df   :  { %v1225_v51 = vrot.slane %v1224_v50, 4 }
 0x1e1   :  { %v1226_v47 = vadd.f32 %v1225_v51, %v1224_v50  ;;  %v50_v51 = vld [vmem:[#allocation2 + $0x3c] sm:$0xf] }
 0x1e2   :  { %v1013_v21 = vunpack.c.l.bf16 %v50_v51 }
 0x1e3   :  { %v1158_v18 = vpop.permute.xlu1 %1157  ;;  %v1227_v55 = vrot.slane %v1226_v47, 2 }
 0x1e4   :  { %v1215_v20 = vmul.f32 %v1158_v18, %v1023_v12  ;;  %v2460_v48 = vpop.permute.xlu2 %1122  ;;  %v1073_v36 = vpop.permute.xlu0 %1072  ;;  %v1232_v12 = vsel %vm163_vm0, %v1193_v35, 0.0  ;;  %v1002_v18 = vunpack.c.h.bf16 %v38_v5 }
 0x1e5   :  { %v1198_v16 = vmul.f32 %v1073_v36, %v1006_v57  ;;  %v2494_v36 = vld [vmem:[#allocation2 + $0x54] sm:$0xff]   ;;  %v2498_v14 = vadd.f32 %v1227_v55, %v1226_v47 }
 0x1e6   :  { %v1331_v38 = vsel %vm163_vm0, %v1215_v20, 0.0  ;;  %v1009_v20 = vunpack.c.l.bf16 %v46_v28  ;;  %v1019_v58 = vunpack.c.l.bf16 %v2494_v36 }
 0x1e7   :  { %v2464_v41 = vadd.f32 %v1331_v38, %v1330_v26  ;;  %v1258_v49 = vsel %vm163_vm0, %v1198_v16, 0.0  ;;  %v55_v26 = vld [vmem:[#allocation2 + $0x50] sm:$0xf]  ;;  %v1208_v38 = vmul.f32 %v2460_v48, %v1016_v40  ;;  %v1229_v28 = vrot.slane %v2498_v14, 1 }
 0x1e8   :  { %v1260_v6 = vadd.f32 %v1259_v54, %v1258_v49  ;;  %v1018_v57 = vunpack.c.l.bf16 %v55_v26 }
 0x1e9   :  { %v1333_v59 = vrot.slane %v2464_v41, 4 }
 0x1ea   :  { %v1261_v13 = vrot.slane %v1260_v6, 4 }
 0x1ec   :  { %v2466_v56 = vpop.permute.xlu2 %1167  ;;  %v1118_v52 = vpop.permute.xlu0 %1117 }
 0x1ed   :  { %v1207_v31 = vmul.f32 %v1118_v52, %v1015_v17  ;;  %v1025_v52 = vunpack.c.l.bf16 %v2486_v2  ;;  %v1303_v17 = vsel %vm163_vm0, %v1208_v38, 0.0 }
 0x1ef   :  { %v1295_v29 = vsel %vm163_vm0, %v1207_v31, 0.0 }
 0x1f0   :  { %v1296_v23 = vadd.f32 %v1295_v29, %v1294_v9 }
 0x1f1   :  { %v1043_v63 = vpop.permute.xlu1 %1042 }
 0x1f2   :  { %v1192_v25 = vmul.f32 %v1043_v63, %v1000_v45  ;;  %v1297_v3 = vrot.slane %v1296_v23, 4 }
 0x1f4   :  { %v2468_v46 = vpop.permute.xlu2 %1052  ;;  %v2470_v34 = vpop.permute.xlu0 %1087  ;;  %v1231_v4 = vsel %vm163_vm0, %v1192_v25, 0.0  ;;  %v1298_v25 = vadd.f32 %v1297_v3, %v1296_v23 }
 0x1f5   :  { %v1233_v63 = vadd.f32 %v1232_v12, %v1231_v4  ;;  %v1194_v15 = vmul.f32 %v2468_v46, %v1002_v18  ;;  %v1201_v48 = vmul.f32 %v2470_v34, %v1009_v20 }
 0x1f6   :  { %v1299_v23 = vrot.slane %v1298_v25, 2 }
 0x1f7   :  { %v1234_v45 = vrot.slane %v1233_v63, 4  ;;  %v1240_v27 = vsel %vm163_vm0, %v1194_v15, 0.0  ;;  %v1268_v49 = vsel %vm163_vm0, %v1201_v48, 0.0 }
 0x1f9   :  { %v1083_v60 = vpop.permute.xlu1 %1082  ;;  %v1235_v54 = vadd.f32 %v1234_v45, %v1233_v63 }
 0x1fa   :  { %v1200_v33 = vmul.f32 %v1083_v60, %v1008_v7  ;;  %v1012_v60 = vunpack.c.h.bf16 %v48_v1 }
 0x1fb   :  { %v1236_v26 = vrot.slane %v1235_v54, 2 }
 0x1fc   :  { %v2473_v32 = vpop.permute.xlu2 %1092  ;;  %v2479_v10 = vpop.permute.xlu0 %1162  ;;  %v1267_v24 = vsel %vm163_vm0, %v1200_v33, 0.0  ;;  %v1004_v33 = vunpack.c.h.bf16 %v2482_v44  ;;  %v1230_v44 = vadd.f32 %v1229_v28, %v2498_v14 }
 0x1fd   :  { %v1269_v55 = vadd.f32 %v1268_v49, %v1267_v24  ;;  %v1216_v4 = vmul.f32 %v2479_v10, %v1024_v42  ;;  %v1237_v15 = vadd.f32 %v1236_v26, %v1235_v54 }
 0x201   :  { %v1128_v37 = vpop.permute.xlu1 %1127 }
 0x202   :  { %v1209_v50 = vmul.f32 %v1128_v37, %v1017_v11  ;;  %v1262_v37 = vadd.f32 %v1261_v13, %v1260_v6  ;;  %v1202_v6 = vmul.f32 %v2473_v32, %v1010_v0  ;;  %v2517_v11 = vadd.f32 %v1333_v59, %v2464_v41  ;;  %v64_v0 = vld [vmem:[#allocation2 + $0x74] sm:$0xf] }
 0x203   :  { %v1270_v32 = vrot.slane %v1269_v55, 4  ;;  %v1027_v42 = vunpack.c.l.bf16 %v64_v0 }
 0x204   :  { %v1138_v53 = vpop.permute.xlu2 %1137  ;;  %v1133_v43 = vpop.permute.xlu0 %1132  ;;  %v1304_v46 = vsel %vm163_vm0, %v1209_v50, 0.0  ;;  %v1263_v12 = vrot.slane %v1262_v37, 2 }
 0x205   :  { %v1211_v31 = vmul.f32 %v1138_v53, %v1019_v58  ;;  %v1210_v34 = vmul.f32 %v1133_v43, %v1018_v57  ;;  %v1305_v53 = vadd.f32 %v1304_v46, %v1303_v17  ;;  %v1217_v43 = vmul.f32 %v2466_v56, %v1025_v52 }
 0x206   :  { %v1276_v56 = vsel %vm163_vm0, %v1202_v6, 0.0  ;;  %v1339_v52 = vsel %vm163_vm0, %v1216_v4, 0.0  ;;  %v1264_v50 = vadd.f32 %v1263_v12, %v1262_v37  ;;  %v1300_v58 = vadd.f32 %v1299_v23, %v1298_v25 }
 0x207   :  { %v1313_v7 = vsel %vm163_vm0, %v1211_v31, 0.0  ;;  %v1306_v1 = vrot.slane %v1305_v53, 4  ;;  %v1340_v41 = vsel %vm163_vm0, %v1217_v43, 0.0  ;;  %v1026_v57 = vunpack.c.h.bf16 %v2486_v2  ;;  %v58_v31 = vld [vmem:[#allocation2 + $0x5c] sm:$0xf] }
 0x208   :  { %v1341_v48 = vadd.f32 %v1340_v41, %v1339_v52  ;;  %v1271_v51 = vadd.f32 %v1270_v32, %v1269_v55  ;;  %v1265_v37 = vrot.slane %v1264_v50, 1  ;;  %v1301_v2 = vrot.slane %v1300_v58, 1 }
 0x209   :  { %v1058_v61 = vpop.permute.xlu1 %1057  ;;  %v1307_v17 = vadd.f32 %v1306_v1, %v1305_v53 }
 0x20a   :  { %v1195_v8 = vmul.f32 %v1058_v61, %v1003_v30  ;;  %v1312_v30 = vsel %vm163_vm0, %v1210_v34, 0.0  ;;  %v1238_v34 = vrot.slane %v1237_v15, 1  ;;  %v1272_v49 = vrot.slane %v1271_v51, 2 }
 0x20b   :  { %v1314_v13 = vadd.f32 %v1313_v7, %v1312_v30  ;;  %v1020_v7 = vunpack.c.h.bf16 %v2494_v36 }
 0x20c   :  { %v2491_v22 = vpop.permute.xlu2 %1062  ;;  %v1241_v47 = vsel %vm163_vm0, %v1195_v8, 0.0  ;;  %v1239_v53 = vadd.f32 %v1238_v34, %v1237_v15  ;;  %v1273_v12 = vadd.f32 %v1272_v49, %v1271_v51 }
 0x20d   :  { %v1242_v40 = vadd.f32 %v1241_v47, %v1240_v27  ;;  %v1315_v45 = vrot.slane %v1314_v13, 4 }
 0x20e   :  { %v1383_v36 = vsel %vm1382_vm6, %v1239_v53, %v1230_v44 }
 0x20f   :  { %v1243_v38 = vrot.slane %v1242_v40, 4 }
 0x211   :  { %v1098_v5 = vpop.permute.xlu1 %1097 }
 0x212   :  { %v1103_v16 = vpop.permute.xlu0 %1102  ;;  %v1203_v35 = vmul.f32 %v1098_v5, %v1011_v62  ;;  %v1244_v62 = vadd.f32 %v1243_v38, %v1242_v40  ;;  %v1005_v5 = vunpack.c.l.bf16 %v2476_v19  ;;  %v1342_v19 = vrot.slane %v1341_v48, 4  ;;  %v65_v38 = vld [vmem:[#allocation2 + $0x78] sm:$0xff]  }
 0x213   :  { %v1204_v29 = vmul.f32 %v1103_v16, %v1012_v60  ;;  %v1335_v60 = vrot.slane %v2517_v11, 2  ;;  %v1196_v16 = vmul.f32 %v2491_v22, %v1004_v33  ;;  %v1021_v40 = vunpack.c.l.bf16 %v58_v31 }
 0x214   :  { %v1108_v61 = vpop.permute.xlu2 %1107  ;;  %v1277_v18 = vsel %vm163_vm0, %v1203_v35, 0.0  ;;  %v1308_v35 = vrot.slane %v1307_v17, 2  ;;  %v1343_v23 = vadd.f32 %v1342_v19, %v1341_v48  ;;  %v1029_v44 = vunpack.c.h.bf16 %v65_v38 }
 0x215   :  { %v1205_v9 = vmul.f32 %v1108_v61, %v1013_v21  ;;  %v1285_v10 = vsel %vm163_vm0, %v1204_v29, 0.0  ;;  %v1278_v39 = vadd.f32 %v1277_v18, %v1276_v56  ;;  %v1245_v21 = vrot.slane %v1244_v62, 2 }
 0x216   :  { %v1316_v61 = vadd.f32 %v1315_v45, %v1314_v13  ;;  %v1249_v54 = vsel %vm163_vm0, %v1196_v16, 0.0  ;;  %v1309_v26 = vadd.f32 %v1308_v35, %v1307_v17  ;;  %v1302_v56 = vadd.f32 %v1301_v2, %v1300_v58 }
 0x217   :  { %v1286_v8 = vsel %vm163_vm0, %v1205_v9, 0.0  ;;  %v1279_v59 = vrot.slane %v1278_v39, 4  ;;  %v1246_v43 = vadd.f32 %v1245_v21, %v1244_v62  ;;  %v2537_v9 = vadd.f32 %v1335_v60, %v2517_v11 }
 0x218   :  { %v1287_v3 = vadd.f32 %v1286_v8, %v1285_v10  ;;  %v1317_v52 = vrot.slane %v1316_v61, 2  ;;  %v1274_v8 = vrot.slane %v1273_v12, 1  ;;  %v1344_v0 = vrot.slane %v1343_v23, 2 }
 0x219   :  { %v1173_v20 = vpop.permute.xlu1 %1172  ;;  %v1280_v55 = vadd.f32 %v1279_v59, %v1278_v39  ;;  %v1247_v33 = vrot.slane %v1246_v43, 1 }
 0x21a   :  { %v1148_v63 = vpop.permute.xlu0 %1147  ;;  %v1218_v24 = vmul.f32 %v1173_v20, %v1026_v57  ;;  %v1288_v47 = vrot.slane %v1287_v3, 4  ;;  %v1266_v20 = vadd.f32 %v1265_v37, %v1264_v50  ;;  %v1028_v57 = vunpack.c.l.bf16 %v65_v38 }
 0x21b   :  { %v1281_v32 = vrot.slane %v1280_v55, 2  ;;  %v1213_v10 = vmul.f32 %v1148_v63, %v1021_v40  ;;  %v1310_v50 = vrot.slane %v1309_v26, 1  ;;  %v1318_v62 = vadd.f32 %v1317_v52, %v1316_v61 }
 0x21c   :  { %v1348_v29 = vsel %vm163_vm0, %v1218_v24, 0.0  ;;  %v1289_v28 = vadd.f32 %v1288_v47, %v1287_v3  ;;  %v1183_v48 = vpop.permute.xlu2 %1182  ;;  %v1248_v45 = vadd.f32 %v1247_v33, %v1246_v43  ;;  %v1275_v37 = vadd.f32 %v1274_v8, %v1273_v12 }
 0x21d   :  { %v1282_v15 = vadd.f32 %v1281_v32, %v1280_v55  ;;  %v1322_v63 = vsel %vm163_vm0, %v1213_v10, 0.0  ;;  %v1220_v60 = vmul.f32 %v1183_v48, %v1028_v57  ;;  %v1345_v2 = vadd.f32 %v1344_v0, %v1343_v23 }
 0x21e   :  { %v1290_v1 = vrot.slane %v1289_v28, 2  ;;  %v1311_v24 = vadd.f32 %v1310_v50, %v1309_v26 }
 0x21f   :  { %v1283_v47 = vrot.slane %v1282_v15, 1  ;;  %v1357_v35 = vsel %vm163_vm0, %v1220_v60, 0.0 }
 0x221   :  { %v1068_v46 = vpop.permute.xlu1 %1067 }
 0x222   :  { %v1197_v25 = vmul.f32 %v1068_v46, %v1005_v5  ;;  %v1178_v27 = vpop.permute.xlu0 %1177  ;;  %v1291_v5 = vadd.f32 %v1290_v1, %v1289_v28  ;;  %v1319_v46 = vrot.slane %v1318_v62, 1 }
 0x223   :  { %v1219_v14 = vmul.f32 %v1178_v27, %v1027_v42 }
 0x224   :  { %v1250_v22 = vsel %vm163_vm0, %v1197_v25, 0.0  ;;  %v1292_v31 = vrot.slane %v1291_v5, 1  ;;  %v1385_v25 = vsel %vm1384_vm7, %v1248_v45, %v1383_v36  ;;  %v1320_v53 = vadd.f32 %v1319_v46, %v1318_v62 }
 0x225   :  { %v1251_v6 = vadd.f32 %v1250_v22, %v1249_v54  ;;  %v1349_v4 = vsel %vm163_vm0, %v1219_v14, 0.0  ;;  %v1284_v54 = vadd.f32 %v1283_v47, %v1282_v15 }
 0x226   :  { %v1350_v30 = vadd.f32 %v1349_v4, %v1348_v29  ;;  %v1293_v40 = vadd.f32 %v1292_v31, %v1291_v5  ;;  %v1337_v4 = vrot.slane %v2537_v9, 1 }
 0x227   :  { %v1252_v18 = vrot.slane %v1251_v6, 4 }
 0x228   :  { %v1351_v11 = vrot.slane %v1350_v30, 4  ;;  %v1338_v38 = vadd.f32 %v1337_v4, %v2537_v9 }
 0x229   :  { %v1253_v13 = vadd.f32 %v1252_v18, %v1251_v6  ;;  %v1143_v41 = vpop.permute.xlu1 %1142 }
 0x22a   :  { %v1212_v39 = vmul.f32 %v1143_v41, %v1020_v7  ;;  %v1352_v42 = vadd.f32 %v1351_v11, %v1350_v30  ;;  %v1396_v30 = vsel %vm1382_vm6, %v1311_v24, %v1302_v56 }
 0x22b   :  { %v1254_v3 = vrot.slane %v1253_v13, 2  ;;  %v1397_v10 = vsel %vm1384_vm7, %v1320_v53, %v1396_v30 }
 0x22c   :  { %v1321_v58 = vsel %vm163_vm0, %v1212_v39, 0.0  ;;  %v1353_v27 = vrot.slane %v1352_v42, 2 }
 0x22d   :  { %v1255_v51 = vadd.f32 %v1254_v3, %v1253_v13  ;;  %v1323_v17 = vadd.f32 %v1322_v63, %v1321_v58 }
 0x22e   :  { %v1354_v43 = vadd.f32 %v1353_v27, %v1352_v42 }
 0x22f   :  { %v1256_v16 = vrot.slane %v1255_v51, 1  ;;  %v1324_v59 = vrot.slane %v1323_v17, 4 }
 0x230   :  { %v1355_v52 = vrot.slane %v1354_v43, 1 }
 0x231   :  { %v1257_v34 = vadd.f32 %v1256_v16, %v1255_v51  ;;  %v1325_v19 = vadd.f32 %v1324_v59, %v1323_v17  ;;  %v1188_v21 = vpop.permute.xlu1 %1187 }
 0x232   :  { %v1221_v49 = vmul.f32 %v1188_v21, %v1029_v44  ;;  %v1356_v33 = vadd.f32 %v1355_v52, %v1354_v43 }
 0x233   :  { %v1387_v61 = vsel %vm1386_vm8, %v1257_v34, %v1385_v25  ;;  %v1326_v14 = vrot.slane %v1325_v19, 2 }
 0x234   :  { %v1389_v55 = vsel %vm1388_vm9, %v1266_v20, %v1387_v61  ;;  %v1358_v22 = vsel %vm163_vm0, %v1221_v49, 0.0  ;;  %v1346_v20 = vrot.slane %v1345_v2, 1 }
 0x235   :  { %v1327_v29 = vadd.f32 %v1326_v14, %v1325_v19  ;;  %v1359_v28 = vadd.f32 %v1358_v22, %v1357_v35  ;;  %v1391_v6 = vsel %vm1390_vm10, %v1275_v37, %v1389_v55 }
 0x236   :  { %v1393_v7 = vsel %vm1392_vm11, %v1284_v54, %v1391_v6  ;;  %v1347_v56 = vadd.f32 %v1346_v20, %v1345_v2 }
 0x237   :  { %v1328_v12 = vrot.slane %v1327_v29, 1  ;;  %v1360_v23 = vrot.slane %v1359_v28, 4  ;;  %v1395_v18 = vsel %vm1394_vm12, %v1293_v40, %v1393_v7 }
 0x238   :  { %1405 = vst.msk [vmem:[#allocation5] sm:$0xff] %vm163_vm0, %v1395_v18 }
 0x239   :  { %v1329_v26 = vadd.f32 %v1328_v12, %v1327_v29  ;;  %v1361_v32 = vadd.f32 %v1360_v23, %v1359_v28 }
 0x23b   :  { %v1398_v1 = vsel %vm1386_vm8, %v1329_v26, %v1397_v10  ;;  %v1362_v13 = vrot.slane %v1361_v32, 2 }
 0x23c   :  { %v1399_v41 = vsel %vm1388_vm9, %v1338_v38, %v1398_v1 }
 0x23d   :  { %v1363_v36 = vadd.f32 %v1362_v13, %v1361_v32  ;;  %v1400_v39 = vsel %vm1390_vm10, %v1347_v56, %v1399_v41 }
 0x23e   :  { %v1401_v8 = vsel %vm1392_vm11, %v1356_v33, %v1400_v39 }
 0x23f   :  { %v1364_v9 = vrot.slane %v1363_v36, 1 }
 0x241   :  { %v1365_v11 = vadd.f32 %v1364_v9, %v1363_v36 }
 0x243   :  { %v1402_v0 = vsel %vm1394_vm12, %v1365_v11, %v1401_v8 }
 0x244   :  { %1406 = vst.msk [vmem:[#allocation5 + $0x8] sm:$0xff] %vm163_vm0, %v1402_v0 }
 0x245   :  { %1419 = dma.vmem_to_hbm [thread:$0]  %s1412_s28, 256, %s1414_s5, [#allocation4], %s1782_s6, %s1782_s6, %s1783_s7  }
 0x246   :  { %1775 = dma.done.wait [#allocation4], 256  }
 0x247   :  { %1776 = vsyncadd [#allocation4], 4294967040 }
 0x248   :  { %1424 = vsyncpa [#allocation3], 1 }
 0x249   :  { %1425 = vsyncpa [#allocation4], 1 }

</bundles_post_ra>
